<compile_context>
chip_gen: v7x
topology: tpu7x:2x2x1
jax: 0.10.0
libtpu: 0.0.40
codegen_flags: <defaults>
</compile_context>

<pallas_src>
import math

import jax
import jax.numpy as jnp
from jax import lax
from jax.experimental import pallas as pl
from jax.experimental.pallas import tpu as pltpu

# ---------------- small BERT-like config ----------------
VOCAB = 128
HIDDEN = 64
N_LAYERS = 2
N_HEADS = 4
HEAD_DIM = HIDDEN // N_HEADS
INTERMEDIATE = 256
MAX_POS = 16
TYPE_VOCAB = 2
NUM_LABELS = 2
LN_EPS = 1e-12


# ---------------- in-kernel helpers (pure value functions) ----------------
def _ln(x, gamma, beta):
    mean = jnp.mean(x, axis=-1, keepdims=True)
    c = x - mean
    var = jnp.mean(c * c, axis=-1, keepdims=True)
    return c * lax.rsqrt(var + LN_EPS) * gamma + beta


def _gelu_exact(x):
    # exact (erf) GELU, matching BERT
    return 0.5 * x * (1.0 + lax.erf(x * (1.0 / math.sqrt(2.0))))


# ---------------- fully fused BERT kernel ----------------
def _bert_kernel(x_ref, mask_ref,
                 emb_g_ref, emb_b_ref,
                 qkv_w_ref, qkv_b_ref,
                 ao_w_ref, ao_b_ref, ln1_g_ref, ln1_b_ref,
                 i_w_ref, i_b_ref, o_w_ref, o_b_ref,
                 ln2_g_ref, ln2_b_ref,
                 pool_w_ref, pool_b_ref, cls_w_ref, cls_b_ref,
                 logits_ref,
                 x_sc, ctx_sc):
    """Grid = (batch, layer). One step = one encoder layer of one batch element.

    x_ref:   (S, H) raw embedding sum (pre-LN) for this batch element
    mask_ref:(1, S) additive attention mask
    x_sc:    (S, H) VMEM residual-stream carry across the layer axis
    ctx_sc:  (S, H) VMEM per-head context assembly buffer
    """
    layer = pl.program_id(1)
    mask = mask_ref[...]                          # (1, S)

    # Layer 0: initialize the residual stream with the embedding LayerNorm.
    @pl.when(layer == 0)
    def _():
        x_sc[...] = _ln(x_ref[...], emb_g_ref[...], emb_b_ref[...])

    x = x_sc[...]                                 # (S, H)

    # Fused QKV projection: single MXU pass, lane-dense N = 3*H.
    qkv = jnp.dot(x, qkv_w_ref[...],
                  preferred_element_type=jnp.float32) + qkv_b_ref[...]

    scale = 1.0 / math.sqrt(HEAD_DIM)
    for h in range(N_HEADS):                      # static unrolled per-head loop
        qh = qkv[:, h * HEAD_DIM:(h + 1) * HEAD_DIM]
        kh = qkv[:, HIDDEN + h * HEAD_DIM:HIDDEN + (h + 1) * HEAD_DIM]
        vh = qkv[:, 2 * HIDDEN + h * HEAD_DIM:2 * HIDDEN + (h + 1) * HEAD_DIM]
        # scores: contract the shared head_dim directly (no explicit k.T)
        s = lax.dot_general(qh, kh, (((1,), (1,)), ((), ())),
                            preferred_element_type=jnp.float32) * scale
        s = s + mask                              # (S, S) + (1, S)
        s = s - jnp.max(s, axis=-1, keepdims=True)
        p = jnp.exp(s)
        p = p * pl.reciprocal(jnp.sum(p, axis=-1, keepdims=True), approx=True)
        ctx_sc[:, h * HEAD_DIM:(h + 1) * HEAD_DIM] = jnp.dot(
            p, vh, preferred_element_type=jnp.float32)

    ctx = ctx_sc[...]                             # (S, H)

    # attention output proj + residual + LayerNorm (fused)
    attn_out = jnp.dot(ctx, ao_w_ref[...],
                       preferred_element_type=jnp.float32) + ao_b_ref[...]
    h1 = _ln(attn_out + x, ln1_g_ref[...], ln1_b_ref[...])

    # FFN: intermediate (exact GELU) -> output proj + residual + LayerNorm
    inter = _gelu_exact(jnp.dot(h1, i_w_ref[...],
                                preferred_element_type=jnp.float32) + i_b_ref[...])
    ffn = jnp.dot(inter, o_w_ref[...],
                  preferred_element_type=jnp.float32) + o_b_ref[...]
    out = _ln(ffn + h1, ln2_g_ref[...], ln2_b_ref[...])
    x_sc[...] = out                               # carry residual stream to next layer

    # Last layer: pooler (tanh on [CLS]) + classifier, fused into this grid step.
    @pl.when(layer == pl.num_programs(1) - 1)
    def _():
        cls_tok = out[0:1, :]                     # (1, H)  [CLS] token
        pooled = jnp.tanh(jnp.dot(cls_tok, pool_w_ref[...],
                                  preferred_element_type=jnp.float32)
                          + pool_b_ref[...])
        logits_ref[...] = (jnp.dot(pooled, cls_w_ref[...],
                                   preferred_element_type=jnp.float32)
                           + cls_b_ref[...])      # (1, NUM_LABELS)


def bert_fused_call(params, x_emb, mask_add, B, S):
    """x_emb: (B*S, H) embedding sum (pre-LN); mask_add: (B, 1, S). -> (B, 1, NUM_LABELS)."""
    H, I, L = HIDDEN, INTERMEDIATE, N_LAYERS

    def shared(shape):       # replicated param, identical for every grid step
        return pl.BlockSpec(shape, lambda b, l: (0,) * len(shape))

    def layered(shape):      # per-layer stacked param (leading L axis squeezed)
        return pl.BlockSpec((None,) + shape, lambda b, l: (l, 0, 0))

    return pl.pallas_call(
        _bert_kernel,
        grid=(B, L),
        out_shape=jax.ShapeDtypeStruct((B, 1, NUM_LABELS), jnp.float32),
        in_specs=[
            pl.BlockSpec((S, H), lambda b, l: (b, 0)),           # embeddings (pre-LN)
            pl.BlockSpec((None, 1, S), lambda b, l: (b, 0, 0)),  # additive mask
            shared((1, H)), shared((1, H)),                      # emb LN gamma/beta
            layered((H, 3 * H)), layered((1, 3 * H)),            # fused QKV
            layered((H, H)), layered((1, H)),                    # attn output proj
            layered((1, H)), layered((1, H)),                    # LN1 gamma/beta
            layered((H, I)), layered((1, I)),                    # FFN intermediate
            layered((I, H)), layered((1, H)),                    # FFN output
            layered((1, H)), layered((1, H)),                    # LN2 gamma/beta
            shared((H, H)), shared((1, H)),                      # pooler
            shared((H, NUM_LABELS)), shared((1, NUM_LABELS)),    # classifier
        ],
        out_specs=pl.BlockSpec((None, 1, NUM_LABELS), lambda b, l: (b, 0, 0)),
        scratch_shapes=[pltpu.VMEM((S, H), jnp.float32),   # residual-stream carry
                        pltpu.VMEM((S, H), jnp.float32)],  # per-head ctx assembly
        compiler_params=pltpu.CompilerParams(
            dimension_semantics=("parallel", "arbitrary")),      # batch across TCs
    )(x_emb, mask_add,
      params["emb_ln_g"], params["emb_ln_b"],
      params["qkv_w"], params["qkv_b"],
      params["ao_w"], params["ao_b"], params["ln1_g"], params["ln1_b"],
      params["i_w"], params["i_b"], params["o_w"], params["o_b"],
      params["ln2_g"], params["ln2_b"],
      params["pooler_w"], params["pooler_b"],
      params["cls_w"], params["cls_b"])


# ---------------- model ----------------
def bert_cls_forward(params, input_ids, token_type_ids, attention_mask):
    B, S = input_ids.shape
    # embedding gathers are XLA glue; everything else is one fused Pallas kernel
    pos_ids = jnp.arange(S)[None, :]
    emb = (params["word_emb"][input_ids]
           + params["pos_emb"][pos_ids]
           + params["type_emb"][token_type_ids])                # (B, S, H)
    x = emb.reshape(B * S, HIDDEN)
    # TODO(synk): nn.Dropout(hidden_dropout_prob) is stochastic; identity at inference.
    mask_add = ((1.0 - attention_mask.astype(jnp.float32)) * -10000.0).reshape(B, 1, S)
    logits = bert_fused_call(params, x, mask_add, B, S)          # (B, 1, NUM_LABELS)
    return logits.reshape(B, NUM_LABELS)


# ---------------- deterministic parameter init ----------------
# Weights stored pre-transposed (K, N) (torch nn.Linear stores (N, K)); biases
# and LN params stored (1, N). Per-layer params stacked with a leading L axis.
def init_params(key):
    ks = iter(jax.random.split(key, 64))

    def nrm(shape, std=0.02):
        return (std * jax.random.normal(next(ks), shape)).astype(jnp.float32)

    def zeros(shape):
        return jnp.zeros(shape, jnp.float32)

    def ones(shape):
        return jnp.ones(shape, jnp.float32)

    L, H, I = N_LAYERS, HIDDEN, INTERMEDIATE
    params = {
        "word_emb": nrm((VOCAB, H)),
        "pos_emb": nrm((MAX_POS, H)),
        "type_emb": nrm((TYPE_VOCAB, H)),
        "emb_ln_g": ones((1, H)),
        "emb_ln_b": zeros((1, H)),
        # encoder layers, stacked along a leading L axis
        "qkv_w": nrm((L, H, 3 * H)), "qkv_b": zeros((L, 1, 3 * H)),
        "ao_w": nrm((L, H, H)), "ao_b": zeros((L, 1, H)),
        "ln1_g": ones((L, 1, H)), "ln1_b": zeros((L, 1, H)),
        "i_w": nrm((L, H, I)), "i_b": zeros((L, 1, I)),
        "o_w": nrm((L, I, H)), "o_b": zeros((L, 1, H)),
        "ln2_g": ones((L, 1, H)), "ln2_b": zeros((L, 1, H)),
        # pooler + classifier (classifier uses xavier_normal_ as in torch)
        "pooler_w": nrm((H, H)),
        "pooler_b": zeros((1, H)),
        "cls_w": (math.sqrt(2.0 / (H + NUM_LABELS))
                  * jax.random.normal(next(ks), (H, NUM_LABELS))).astype(jnp.float32),
        "cls_b": zeros((1, NUM_LABELS)),
    }
    return params


if __name__ == "__main__":
    key = jax.random.PRNGKey(0)
    pkey, ikey = jax.random.split(key)
    params = init_params(pkey)

    B, S = 2, 8
    input_ids = jax.random.randint(ikey, (B, S), 0, VOCAB, dtype=jnp.int32)
    token_type_ids = jnp.zeros((B, S), jnp.int32)
    attention_mask = jnp.ones((B, S), jnp.int32)

    logits = jax.jit(bert_cls_forward)(params, input_ids, token_type_ids, attention_mask)
    jax.block_until_ready(logits)
    assert logits.shape == (B, NUM_LABELS) and logits.dtype == jnp.float32
    assert bool(jnp.all(jnp.isfinite(logits)))
    print("KERNEL_OK")
</pallas_src>

<mosaic_0001>
module attributes {stable_mosaic.version = 11 : i64} {
  func.func @_bert_kernel(%arg0: i32, %arg1: i32, %arg2: memref<8x64xf32, #tpu.memory_space<vmem>>, %arg3: memref<1x1x8xf32, #tpu.memory_space<vmem>>, %arg4: memref<1x64xf32, #tpu.memory_space<vmem>>, %arg5: memref<1x64xf32, #tpu.memory_space<vmem>>, %arg6: memref<1x64x192xf32, #tpu.memory_space<vmem>>, %arg7: memref<1x1x192xf32, #tpu.memory_space<vmem>>, %arg8: memref<1x64x64xf32, #tpu.memory_space<vmem>>, %arg9: memref<1x1x64xf32, #tpu.memory_space<vmem>>, %arg10: memref<1x1x64xf32, #tpu.memory_space<vmem>>, %arg11: memref<1x1x64xf32, #tpu.memory_space<vmem>>, %arg12: memref<1x64x256xf32, #tpu.memory_space<vmem>>, %arg13: memref<1x1x256xf32, #tpu.memory_space<vmem>>, %arg14: memref<1x256x64xf32, #tpu.memory_space<vmem>>, %arg15: memref<1x1x64xf32, #tpu.memory_space<vmem>>, %arg16: memref<1x1x64xf32, #tpu.memory_space<vmem>>, %arg17: memref<1x1x64xf32, #tpu.memory_space<vmem>>, %arg18: memref<64x64xf32, #tpu.memory_space<vmem>>, %arg19: memref<1x64xf32, #tpu.memory_space<vmem>>, %arg20: memref<64x2xf32, #tpu.memory_space<vmem>>, %arg21: memref<1x2xf32, #tpu.memory_space<vmem>>, %arg22: memref<1x1x2xf32, #tpu.memory_space<vmem>>, %arg23: memref<8x64xf32, #tpu.memory_space<vmem>>, %arg24: memref<8x64xf32, #tpu.memory_space<vmem>>) attributes {dimension_semantics = [#tpu.dimension_semantics<parallel>, #tpu.dimension_semantics<arbitrary>], iteration_bounds = array<i64: 2, 2>, scalar_prefetch = 0 : i64, scratch_operands = 2 : i64, tpu.core_type = #tpu.core_type<tc>, window_params = [{transform_indices = @transform_0, window_bounds = array<i64: 8, 64>}, {transform_indices = @transform_1, window_bounds = array<i64: 1, 1, 8>}, {pipeline_mode = #tpu.pipeline_mode<synchronous>, transform_indices = @transform_2, window_bounds = array<i64: 1, 64>}, {pipeline_mode = #tpu.pipeline_mode<synchronous>, transform_indices = @transform_3, window_bounds = array<i64: 1, 64>}, {transform_indices = @transform_4, window_bounds = array<i64: 1, 64, 192>}, {transform_indices = @transform_5, window_bounds = array<i64: 1, 1, 192>}, {transform_indices = @transform_6, window_bounds = array<i64: 1, 64, 64>}, {transform_indices = @transform_7, window_bounds = array<i64: 1, 1, 64>}, {transform_indices = @transform_8, window_bounds = array<i64: 1, 1, 64>}, {transform_indices = @transform_9, window_bounds = array<i64: 1, 1, 64>}, {transform_indices = @transform_10, window_bounds = array<i64: 1, 64, 256>}, {transform_indices = @transform_11, window_bounds = array<i64: 1, 1, 256>}, {transform_indices = @transform_12, window_bounds = array<i64: 1, 256, 64>}, {transform_indices = @transform_13, window_bounds = array<i64: 1, 1, 64>}, {transform_indices = @transform_14, window_bounds = array<i64: 1, 1, 64>}, {transform_indices = @transform_15, window_bounds = array<i64: 1, 1, 64>}, {pipeline_mode = #tpu.pipeline_mode<synchronous>, transform_indices = @transform_16, window_bounds = array<i64: 64, 64>}, {pipeline_mode = #tpu.pipeline_mode<synchronous>, transform_indices = @transform_17, window_bounds = array<i64: 1, 64>}, {pipeline_mode = #tpu.pipeline_mode<synchronous>, transform_indices = @transform_18, window_bounds = array<i64: 64, 2>}, {pipeline_mode = #tpu.pipeline_mode<synchronous>, transform_indices = @transform_19, window_bounds = array<i64: 1, 2>}, {transform_indices = @transform_20, window_bounds = array<i64: 1, 1, 2>}]} {
    %c0 = arith.constant 0 : index
    %c0_0 = arith.constant 0 : index
    %c0_1 = arith.constant 0 : index
    %0 = vector.load %arg3[%c0, %c0_0, %c0_1] : memref<1x1x8xf32, #tpu.memory_space<vmem>>, vector<1x1x8xf32>
    %1 = vector.shape_cast %0 : vector<1x1x8xf32> to vector<1x8xf32>
    %c0_i32 = arith.constant 0 : i32
    %2 = arith.cmpi eq, %arg1, %c0_i32 : i32
    %3 = arith.extui %2 : i1 to i32
    %c0_i32_2 = arith.constant 0 : i32
    %4 = arith.cmpi ne, %3, %c0_i32_2 : i32
    scf.if %4 {
      %c0_87 = arith.constant 0 : index
      %c0_88 = arith.constant 0 : index
      %177 = vector.load %arg2[%c0_87, %c0_88] : memref<8x64xf32, #tpu.memory_space<vmem>>, vector<8x64xf32>
      %c0_89 = arith.constant 0 : index
      %c0_90 = arith.constant 0 : index
      %178 = vector.load %arg4[%c0_89, %c0_90] : memref<1x64xf32, #tpu.memory_space<vmem>>, vector<1x64xf32>
      %c0_91 = arith.constant 0 : index
      %c0_92 = arith.constant 0 : index
      %179 = vector.load %arg5[%c0_91, %c0_92] : memref<1x64xf32, #tpu.memory_space<vmem>>, vector<1x64xf32>
      %cst_93 = arith.constant dense<0.000000e+00> : vector<8xf32>
      %180 = vector.multi_reduction <add>, %177, %cst_93 [1] : vector<8x64xf32> to vector<8xf32>
      %181 = vector.shape_cast %180 : vector<8xf32> to vector<8x1xf32>
      %cst_94 = arith.constant 6.400000e+01 : f32
      %182 = vector.broadcast %cst_94 : f32 to vector<8x1xf32>
      %183 = arith.divf %181, %182 : vector<8x1xf32>
      %184 = vector.broadcast %183 : vector<8x1xf32> to vector<8x64xf32>
      %185 = arith.subf %177, %184 : vector<8x64xf32>
      %186 = arith.mulf %185, %185 : vector<8x64xf32>
      %cst_95 = arith.constant dense<0.000000e+00> : vector<8xf32>
      %187 = vector.multi_reduction <add>, %186, %cst_95 [1] : vector<8x64xf32> to vector<8xf32>
      %188 = vector.shape_cast %187 : vector<8xf32> to vector<8x1xf32>
      %cst_96 = arith.constant 6.400000e+01 : f32
      %189 = vector.broadcast %cst_96 : f32 to vector<8x1xf32>
      %190 = arith.divf %188, %189 : vector<8x1xf32>
      %cst_97 = arith.constant 9.99999996E-13 : f32
      %191 = vector.broadcast %cst_97 : f32 to vector<8x1xf32>
      %192 = arith.addf %190, %191 : vector<8x1xf32>
      %193 = math.rsqrt %192 : vector<8x1xf32>
      %194 = vector.broadcast %193 : vector<8x1xf32> to vector<8x64xf32>
      %195 = arith.mulf %185, %194 : vector<8x64xf32>
      %196 = vector.broadcast %178 : vector<1x64xf32> to vector<8x64xf32>
      %197 = arith.mulf %195, %196 : vector<8x64xf32>
      %198 = vector.broadcast %179 : vector<1x64xf32> to vector<8x64xf32>
      %199 = arith.addf %197, %198 : vector<8x64xf32>
      %c0_98 = arith.constant 0 : index
      %c0_99 = arith.constant 0 : index
      %200 = vector.load %arg23[%c0_98, %c0_99] : memref<8x64xf32, #tpu.memory_space<vmem>>, vector<8x64xf32>
      tpu.vector_store %arg23[%c0_98, %c0_99], %199 {strides = array<i32>} : memref<8x64xf32, #tpu.memory_space<vmem>>, vector<8x64xf32>,
    } else {
    }
    %c0_3 = arith.constant 0 : index
    %c0_4 = arith.constant 0 : index
    %5 = vector.load %arg23[%c0_3, %c0_4] : memref<8x64xf32, #tpu.memory_space<vmem>>, vector<8x64xf32>
    %c0_5 = arith.constant 0 : index
    %c0_6 = arith.constant 0 : index
    %c0_7 = arith.constant 0 : index
    %6 = vector.load %arg6[%c0_5, %c0_6, %c0_7] : memref<1x64x192xf32, #tpu.memory_space<vmem>>, vector<1x64x192xf32>
    %7 = vector.shape_cast %6 : vector<1x64x192xf32> to vector<64x192xf32>
    %cst = arith.constant dense<0.000000e+00> : vector<8x192xf32>
    %8 = tpu.matmul %5, %7, %cst {dimension_numbers = #tpu.dot_dimension_numbers<[1], [0], [0], [1], [0, 0, 1, 1], [], []>} : vector<8x64xf32>, vector<64x192xf32>, vector<8x192xf32> -> vector<8x192xf32>
    %c0_8 = arith.constant 0 : index
    %c0_9 = arith.constant 0 : index
    %c0_10 = arith.constant 0 : index
    %9 = vector.load %arg7[%c0_8, %c0_9, %c0_10] : memref<1x1x192xf32, #tpu.memory_space<vmem>>, vector<1x1x192xf32>
    %10 = vector.shape_cast %9 : vector<1x1x192xf32> to vector<1x192xf32>
    %11 = vector.broadcast %10 : vector<1x192xf32> to vector<8x192xf32>
    %12 = arith.addf %8, %11 : vector<8x192xf32>
    %13 = vector.extract_strided_slice %12 {offsets = [0, 0], sizes = [8, 16], strides = [1, 1]} : vector<8x192xf32> to vector<8x16xf32>
    %14 = vector.extract_strided_slice %12 {offsets = [0, 64], sizes = [8, 16], strides = [1, 1]} : vector<8x192xf32> to vector<8x16xf32>
    %15 = vector.extract_strided_slice %12 {offsets = [0, 128], sizes = [8, 16], strides = [1, 1]} : vector<8x192xf32> to vector<8x16xf32>
    %cst_11 = arith.constant dense<0.000000e+00> : vector<8x8xf32>
    %16 = tpu.matmul %13, %14, %cst_11 {dimension_numbers = #tpu.dot_dimension_numbers<[1], [1], [0], [0], [0, 0, 1, 0], [], []>} : vector<8x16xf32>, vector<8x16xf32>, vector<8x8xf32> -> vector<8x8xf32>
    %cst_12 = arith.constant 2.500000e-01 : f32
    %17 = vector.broadcast %cst_12 : f32 to vector<8x8xf32>
    %18 = arith.mulf %16, %17 : vector<8x8xf32>
    %19 = vector.broadcast %1 : vector<1x8xf32> to vector<8x8xf32>
    %20 = arith.addf %18, %19 : vector<8x8xf32>
    %cst_13 = arith.constant dense<0xFF800000> : vector<8xf32>
    %21 = vector.multi_reduction <maximumf>, %20, %cst_13 [1] : vector<8x8xf32> to vector<8xf32>
    %22 = vector.shape_cast %21 : vector<8xf32> to vector<8x1xf32>
    %23 = vector.broadcast %22 : vector<8x1xf32> to vector<8x8xf32>
    %24 = arith.subf %20, %23 : vector<8x8xf32>
    %25 = math.exp %24 : vector<8x8xf32>
    %cst_14 = arith.constant dense<0.000000e+00> : vector<8xf32>
    %26 = vector.multi_reduction <add>, %25, %cst_14 [1] : vector<8x8xf32> to vector<8xf32>
    %27 = vector.shape_cast %26 : vector<8xf32> to vector<8x1xf32>
    %28 = tpu.reciprocal %27 {approx = true} : vector<8x1xf32> -> vector<8x1xf32>
    %29 = vector.broadcast %28 : vector<8x1xf32> to vector<8x8xf32>
    %30 = arith.mulf %25, %29 : vector<8x8xf32>
    %cst_15 = arith.constant dense<0.000000e+00> : vector<8x16xf32>
    %31 = tpu.matmul %30, %15, %cst_15 {dimension_numbers = #tpu.dot_dimension_numbers<[1], [0], [0], [1], [0, 0, 1, 1], [], []>} : vector<8x8xf32>, vector<8x16xf32>, vector<8x16xf32> -> vector<8x16xf32>
    %c0_16 = arith.constant 0 : index
    %c0_17 = arith.constant 0 : index
    %32 = vector.load %arg24[%c0_16, %c0_17] : memref<8x64xf32, #tpu.memory_space<vmem>>, vector<8x16xf32>
    tpu.vector_store %arg24[%c0_16, %c0_17], %31 {strides = array<i32>} : memref<8x64xf32, #tpu.memory_space<vmem>>, vector<8x16xf32>,
    %33 = vector.extract_strided_slice %12 {offsets = [0, 16], sizes = [8, 16], strides = [1, 1]} : vector<8x192xf32> to vector<8x16xf32>
    %34 = vector.extract_strided_slice %12 {offsets = [0, 80], sizes = [8, 16], strides = [1, 1]} : vector<8x192xf32> to vector<8x16xf32>
    %35 = vector.extract_strided_slice %12 {offsets = [0, 144], sizes = [8, 16], strides = [1, 1]} : vector<8x192xf32> to vector<8x16xf32>
    %cst_18 = arith.constant dense<0.000000e+00> : vector<8x8xf32>
    %36 = tpu.matmul %33, %34, %cst_18 {dimension_numbers = #tpu.dot_dimension_numbers<[1], [1], [0], [0], [0, 0, 1, 0], [], []>} : vector<8x16xf32>, vector<8x16xf32>, vector<8x8xf32> -> vector<8x8xf32>
    %cst_19 = arith.constant 2.500000e-01 : f32
    %37 = vector.broadcast %cst_19 : f32 to vector<8x8xf32>
    %38 = arith.mulf %36, %37 : vector<8x8xf32>
    %39 = vector.broadcast %1 : vector<1x8xf32> to vector<8x8xf32>
    %40 = arith.addf %38, %39 : vector<8x8xf32>
    %cst_20 = arith.constant dense<0xFF800000> : vector<8xf32>
    %41 = vector.multi_reduction <maximumf>, %40, %cst_20 [1] : vector<8x8xf32> to vector<8xf32>
    %42 = vector.shape_cast %41 : vector<8xf32> to vector<8x1xf32>
    %43 = vector.broadcast %42 : vector<8x1xf32> to vector<8x8xf32>
    %44 = arith.subf %40, %43 : vector<8x8xf32>
    %45 = math.exp %44 : vector<8x8xf32>
    %cst_21 = arith.constant dense<0.000000e+00> : vector<8xf32>
    %46 = vector.multi_reduction <add>, %45, %cst_21 [1] : vector<8x8xf32> to vector<8xf32>
    %47 = vector.shape_cast %46 : vector<8xf32> to vector<8x1xf32>
    %48 = tpu.reciprocal %47 {approx = true} : vector<8x1xf32> -> vector<8x1xf32>
    %49 = vector.broadcast %48 : vector<8x1xf32> to vector<8x8xf32>
    %50 = arith.mulf %45, %49 : vector<8x8xf32>
    %cst_22 = arith.constant dense<0.000000e+00> : vector<8x16xf32>
    %51 = tpu.matmul %50, %35, %cst_22 {dimension_numbers = #tpu.dot_dimension_numbers<[1], [0], [0], [1], [0, 0, 1, 1], [], []>} : vector<8x8xf32>, vector<8x16xf32>, vector<8x16xf32> -> vector<8x16xf32>
    %c0_23 = arith.constant 0 : index
    %c16 = arith.constant 16 : index
    %52 = vector.load %arg24[%c0_23, %c16] : memref<8x64xf32, #tpu.memory_space<vmem>>, vector<8x16xf32>
    tpu.vector_store %arg24[%c0_23, %c16], %51 {strides = array<i32>} : memref<8x64xf32, #tpu.memory_space<vmem>>, vector<8x16xf32>,
    %53 = vector.extract_strided_slice %12 {offsets = [0, 32], sizes = [8, 16], strides = [1, 1]} : vector<8x192xf32> to vector<8x16xf32>
    %54 = vector.extract_strided_slice %12 {offsets = [0, 96], sizes = [8, 16], strides = [1, 1]} : vector<8x192xf32> to vector<8x16xf32>
    %55 = vector.extract_strided_slice %12 {offsets = [0, 160], sizes = [8, 16], strides = [1, 1]} : vector<8x192xf32> to vector<8x16xf32>
    %cst_24 = arith.constant dense<0.000000e+00> : vector<8x8xf32>
    %56 = tpu.matmul %53, %54, %cst_24 {dimension_numbers = #tpu.dot_dimension_numbers<[1], [1], [0], [0], [0, 0, 1, 0], [], []>} : vector<8x16xf32>, vector<8x16xf32>, vector<8x8xf32> -> vector<8x8xf32>
    %cst_25 = arith.constant 2.500000e-01 : f32
    %57 = vector.broadcast %cst_25 : f32 to vector<8x8xf32>
    %58 = arith.mulf %56, %57 : vector<8x8xf32>
    %59 = vector.broadcast %1 : vector<1x8xf32> to vector<8x8xf32>
    %60 = arith.addf %58, %59 : vector<8x8xf32>
    %cst_26 = arith.constant dense<0xFF800000> : vector<8xf32>
    %61 = vector.multi_reduction <maximumf>, %60, %cst_26 [1] : vector<8x8xf32> to vector<8xf32>
    %62 = vector.shape_cast %61 : vector<8xf32> to vector<8x1xf32>
    %63 = vector.broadcast %62 : vector<8x1xf32> to vector<8x8xf32>
    %64 = arith.subf %60, %63 : vector<8x8xf32>
    %65 = math.exp %64 : vector<8x8xf32>
    %cst_27 = arith.constant dense<0.000000e+00> : vector<8xf32>
    %66 = vector.multi_reduction <add>, %65, %cst_27 [1] : vector<8x8xf32> to vector<8xf32>
    %67 = vector.shape_cast %66 : vector<8xf32> to vector<8x1xf32>
    %68 = tpu.reciprocal %67 {approx = true} : vector<8x1xf32> -> vector<8x1xf32>
    %69 = vector.broadcast %68 : vector<8x1xf32> to vector<8x8xf32>
    %70 = arith.mulf %65, %69 : vector<8x8xf32>
    %cst_28 = arith.constant dense<0.000000e+00> : vector<8x16xf32>
    %71 = tpu.matmul %70, %55, %cst_28 {dimension_numbers = #tpu.dot_dimension_numbers<[1], [0], [0], [1], [0, 0, 1, 1], [], []>} : vector<8x8xf32>, vector<8x16xf32>, vector<8x16xf32> -> vector<8x16xf32>
    %c0_29 = arith.constant 0 : index
    %c32 = arith.constant 32 : index
    %72 = vector.load %arg24[%c0_29, %c32] : memref<8x64xf32, #tpu.memory_space<vmem>>, vector<8x16xf32>
    tpu.vector_store %arg24[%c0_29, %c32], %71 {strides = array<i32>} : memref<8x64xf32, #tpu.memory_space<vmem>>, vector<8x16xf32>,
    %73 = vector.extract_strided_slice %12 {offsets = [0, 48], sizes = [8, 16], strides = [1, 1]} : vector<8x192xf32> to vector<8x16xf32>
    %74 = vector.extract_strided_slice %12 {offsets = [0, 112], sizes = [8, 16], strides = [1, 1]} : vector<8x192xf32> to vector<8x16xf32>
    %75 = vector.extract_strided_slice %12 {offsets = [0, 176], sizes = [8, 16], strides = [1, 1]} : vector<8x192xf32> to vector<8x16xf32>
    %cst_30 = arith.constant dense<0.000000e+00> : vector<8x8xf32>
    %76 = tpu.matmul %73, %74, %cst_30 {dimension_numbers = #tpu.dot_dimension_numbers<[1], [1], [0], [0], [0, 0, 1, 0], [], []>} : vector<8x16xf32>, vector<8x16xf32>, vector<8x8xf32> -> vector<8x8xf32>
    %cst_31 = arith.constant 2.500000e-01 : f32
    %77 = vector.broadcast %cst_31 : f32 to vector<8x8xf32>
    %78 = arith.mulf %76, %77 : vector<8x8xf32>
    %79 = vector.broadcast %1 : vector<1x8xf32> to vector<8x8xf32>
    %80 = arith.addf %78, %79 : vector<8x8xf32>
    %cst_32 = arith.constant dense<0xFF800000> : vector<8xf32>
    %81 = vector.multi_reduction <maximumf>, %80, %cst_32 [1] : vector<8x8xf32> to vector<8xf32>
    %82 = vector.shape_cast %81 : vector<8xf32> to vector<8x1xf32>
    %83 = vector.broadcast %82 : vector<8x1xf32> to vector<8x8xf32>
    %84 = arith.subf %80, %83 : vector<8x8xf32>
    %85 = math.exp %84 : vector<8x8xf32>
    %cst_33 = arith.constant dense<0.000000e+00> : vector<8xf32>
    %86 = vector.multi_reduction <add>, %85, %cst_33 [1] : vector<8x8xf32> to vector<8xf32>
    %87 = vector.shape_cast %86 : vector<8xf32> to vector<8x1xf32>
    %88 = tpu.reciprocal %87 {approx = true} : vector<8x1xf32> -> vector<8x1xf32>
    %89 = vector.broadcast %88 : vector<8x1xf32> to vector<8x8xf32>
    %90 = arith.mulf %85, %89 : vector<8x8xf32>
    %cst_34 = arith.constant dense<0.000000e+00> : vector<8x16xf32>
    %91 = tpu.matmul %90, %75, %cst_34 {dimension_numbers = #tpu.dot_dimension_numbers<[1], [0], [0], [1], [0, 0, 1, 1], [], []>} : vector<8x8xf32>, vector<8x16xf32>, vector<8x16xf32> -> vector<8x16xf32>
    %c0_35 = arith.constant 0 : index
    %c48 = arith.constant 48 : index
    %92 = vector.load %arg24[%c0_35, %c48] : memref<8x64xf32, #tpu.memory_space<vmem>>, vector<8x16xf32>
    tpu.vector_store %arg24[%c0_35, %c48], %91 {strides = array<i32>} : memref<8x64xf32, #tpu.memory_space<vmem>>, vector<8x16xf32>,
    %c0_36 = arith.constant 0 : index
    %c0_37 = arith.constant 0 : index
    %93 = vector.load %arg24[%c0_36, %c0_37] : memref<8x64xf32, #tpu.memory_space<vmem>>, vector<8x64xf32>
    %c0_38 = arith.constant 0 : index
    %c0_39 = arith.constant 0 : index
    %c0_40 = arith.constant 0 : index
    %94 = vector.load %arg8[%c0_38, %c0_39, %c0_40] : memref<1x64x64xf32, #tpu.memory_space<vmem>>, vector<1x64x64xf32>
    %95 = vector.shape_cast %94 : vector<1x64x64xf32> to vector<64x64xf32>
    %cst_41 = arith.constant dense<0.000000e+00> : vector<8x64xf32>
    %96 = tpu.matmul %93, %95, %cst_41 {dimension_numbers = #tpu.dot_dimension_numbers<[1], [0], [0], [1], [0, 0, 1, 1], [], []>} : vector<8x64xf32>, vector<64x64xf32>, vector<8x64xf32> -> vector<8x64xf32>
    %c0_42 = arith.constant 0 : index
    %c0_43 = arith.constant 0 : index
    %c0_44 = arith.constant 0 : index
    %97 = vector.load %arg9[%c0_42, %c0_43, %c0_44] : memref<1x1x64xf32, #tpu.memory_space<vmem>>, vector<1x1x64xf32>
    %98 = vector.shape_cast %97 : vector<1x1x64xf32> to vector<1x64xf32>
    %99 = vector.broadcast %98 : vector<1x64xf32> to vector<8x64xf32>
    %100 = arith.addf %96, %99 : vector<8x64xf32>
    %101 = arith.addf %100, %5 : vector<8x64xf32>
    %c0_45 = arith.constant 0 : index
    %c0_46 = arith.constant 0 : index
    %c0_47 = arith.constant 0 : index
    %102 = vector.load %arg10[%c0_45, %c0_46, %c0_47] : memref<1x1x64xf32, #tpu.memory_space<vmem>>, vector<1x1x64xf32>
    %103 = vector.shape_cast %102 : vector<1x1x64xf32> to vector<1x64xf32>
    %c0_48 = arith.constant 0 : index
    %c0_49 = arith.constant 0 : index
    %c0_50 = arith.constant 0 : index
    %104 = vector.load %arg11[%c0_48, %c0_49, %c0_50] : memref<1x1x64xf32, #tpu.memory_space<vmem>>, vector<1x1x64xf32>
    %105 = vector.shape_cast %104 : vector<1x1x64xf32> to vector<1x64xf32>
    %cst_51 = arith.constant dense<0.000000e+00> : vector<8xf32>
    %106 = vector.multi_reduction <add>, %101, %cst_51 [1] : vector<8x64xf32> to vector<8xf32>
    %107 = vector.shape_cast %106 : vector<8xf32> to vector<8x1xf32>
    %cst_52 = arith.constant 6.400000e+01 : f32
    %108 = vector.broadcast %cst_52 : f32 to vector<8x1xf32>
    %109 = arith.divf %107, %108 : vector<8x1xf32>
    %110 = vector.broadcast %109 : vector<8x1xf32> to vector<8x64xf32>
    %111 = arith.subf %101, %110 : vector<8x64xf32>
    %112 = arith.mulf %111, %111 : vector<8x64xf32>
    %cst_53 = arith.constant dense<0.000000e+00> : vector<8xf32>
    %113 = vector.multi_reduction <add>, %112, %cst_53 [1] : vector<8x64xf32> to vector<8xf32>
    %114 = vector.shape_cast %113 : vector<8xf32> to vector<8x1xf32>
    %cst_54 = arith.constant 6.400000e+01 : f32
    %115 = vector.broadcast %cst_54 : f32 to vector<8x1xf32>
    %116 = arith.divf %114, %115 : vector<8x1xf32>
    %cst_55 = arith.constant 9.99999996E-13 : f32
    %117 = vector.broadcast %cst_55 : f32 to vector<8x1xf32>
    %118 = arith.addf %116, %117 : vector<8x1xf32>
    %119 = math.rsqrt %118 : vector<8x1xf32>
    %120 = vector.broadcast %119 : vector<8x1xf32> to vector<8x64xf32>
    %121 = arith.mulf %111, %120 : vector<8x64xf32>
    %122 = vector.broadcast %103 : vector<1x64xf32> to vector<8x64xf32>
    %123 = arith.mulf %121, %122 : vector<8x64xf32>
    %124 = vector.broadcast %105 : vector<1x64xf32> to vector<8x64xf32>
    %125 = arith.addf %123, %124 : vector<8x64xf32>
    %c0_56 = arith.constant 0 : index
    %c0_57 = arith.constant 0 : index
    %c0_58 = arith.constant 0 : index
    %126 = vector.load %arg12[%c0_56, %c0_57, %c0_58] : memref<1x64x256xf32, #tpu.memory_space<vmem>>, vector<1x64x256xf32>
    %127 = vector.shape_cast %126 : vector<1x64x256xf32> to vector<64x256xf32>
    %cst_59 = arith.constant dense<0.000000e+00> : vector<8x256xf32>
    %128 = tpu.matmul %125, %127, %cst_59 {dimension_numbers = #tpu.dot_dimension_numbers<[1], [0], [0], [1], [0, 0, 1, 1], [], []>} : vector<8x64xf32>, vector<64x256xf32>, vector<8x256xf32> -> vector<8x256xf32>
    %c0_60 = arith.constant 0 : index
    %c0_61 = arith.constant 0 : index
    %c0_62 = arith.constant 0 : index
    %129 = vector.load %arg13[%c0_60, %c0_61, %c0_62] : memref<1x1x256xf32, #tpu.memory_space<vmem>>, vector<1x1x256xf32>
    %130 = vector.shape_cast %129 : vector<1x1x256xf32> to vector<1x256xf32>
    %131 = vector.broadcast %130 : vector<1x256xf32> to vector<8x256xf32>
    %132 = arith.addf %128, %131 : vector<8x256xf32>
    %cst_63 = arith.constant 5.000000e-01 : f32
    %133 = vector.broadcast %cst_63 : f32 to vector<8x256xf32>
    %134 = arith.mulf %133, %132 : vector<8x256xf32>
    %cst_64 = arith.constant 0.707106769 : f32
    %135 = vector.broadcast %cst_64 : f32 to vector<8x256xf32>
    %136 = arith.mulf %132, %135 : vector<8x256xf32>
    %137 = math.erf %136 : vector<8x256xf32>
    %cst_65 = arith.constant 1.000000e+00 : f32
    %138 = vector.broadcast %cst_65 : f32 to vector<8x256xf32>
    %139 = arith.addf %138, %137 : vector<8x256xf32>
    %140 = arith.mulf %134, %139 : vector<8x256xf32>
    %c0_66 = arith.constant 0 : index
    %c0_67 = arith.constant 0 : index
    %c0_68 = arith.constant 0 : index
    %141 = vector.load %arg14[%c0_66, %c0_67, %c0_68] : memref<1x256x64xf32, #tpu.memory_space<vmem>>, vector<1x256x64xf32>
    %142 = vector.shape_cast %141 : vector<1x256x64xf32> to vector<256x64xf32>
    %cst_69 = arith.constant dense<0.000000e+00> : vector<8x64xf32>
    %143 = tpu.matmul %140, %142, %cst_69 {dimension_numbers = #tpu.dot_dimension_numbers<[1], [0], [0], [1], [0, 0, 1, 1], [], []>} : vector<8x256xf32>, vector<256x64xf32>, vector<8x64xf32> -> vector<8x64xf32>
    %c0_70 = arith.constant 0 : index
    %c0_71 = arith.constant 0 : index
    %c0_72 = arith.constant 0 : index
    %144 = vector.load %arg15[%c0_70, %c0_71, %c0_72] : memref<1x1x64xf32, #tpu.memory_space<vmem>>, vector<1x1x64xf32>
    %145 = vector.shape_cast %144 : vector<1x1x64xf32> to vector<1x64xf32>
    %146 = vector.broadcast %145 : vector<1x64xf32> to vector<8x64xf32>
    %147 = arith.addf %143, %146 : vector<8x64xf32>
    %148 = arith.addf %147, %125 : vector<8x64xf32>
    %c0_73 = arith.constant 0 : index
    %c0_74 = arith.constant 0 : index
    %c0_75 = arith.constant 0 : index
    %149 = vector.load %arg16[%c0_73, %c0_74, %c0_75] : memref<1x1x64xf32, #tpu.memory_space<vmem>>, vector<1x1x64xf32>
    %150 = vector.shape_cast %149 : vector<1x1x64xf32> to vector<1x64xf32>
    %c0_76 = arith.constant 0 : index
    %c0_77 = arith.constant 0 : index
    %c0_78 = arith.constant 0 : index
    %151 = vector.load %arg17[%c0_76, %c0_77, %c0_78] : memref<1x1x64xf32, #tpu.memory_space<vmem>>, vector<1x1x64xf32>
    %152 = vector.shape_cast %151 : vector<1x1x64xf32> to vector<1x64xf32>
    %cst_79 = arith.constant dense<0.000000e+00> : vector<8xf32>
    %153 = vector.multi_reduction <add>, %148, %cst_79 [1] : vector<8x64xf32> to vector<8xf32>
    %154 = vector.shape_cast %153 : vector<8xf32> to vector<8x1xf32>
    %cst_80 = arith.constant 6.400000e+01 : f32
    %155 = vector.broadcast %cst_80 : f32 to vector<8x1xf32>
    %156 = arith.divf %154, %155 : vector<8x1xf32>
    %157 = vector.broadcast %156 : vector<8x1xf32> to vector<8x64xf32>
    %158 = arith.subf %148, %157 : vector<8x64xf32>
    %159 = arith.mulf %158, %158 : vector<8x64xf32>
    %cst_81 = arith.constant dense<0.000000e+00> : vector<8xf32>
    %160 = vector.multi_reduction <add>, %159, %cst_81 [1] : vector<8x64xf32> to vector<8xf32>
    %161 = vector.shape_cast %160 : vector<8xf32> to vector<8x1xf32>
    %cst_82 = arith.constant 6.400000e+01 : f32
    %162 = vector.broadcast %cst_82 : f32 to vector<8x1xf32>
    %163 = arith.divf %161, %162 : vector<8x1xf32>
    %cst_83 = arith.constant 9.99999996E-13 : f32
    %164 = vector.broadcast %cst_83 : f32 to vector<8x1xf32>
    %165 = arith.addf %163, %164 : vector<8x1xf32>
    %166 = math.rsqrt %165 : vector<8x1xf32>
    %167 = vector.broadcast %166 : vector<8x1xf32> to vector<8x64xf32>
    %168 = arith.mulf %158, %167 : vector<8x64xf32>
    %169 = vector.broadcast %150 : vector<1x64xf32> to vector<8x64xf32>
    %170 = arith.mulf %168, %169 : vector<8x64xf32>
    %171 = vector.broadcast %152 : vector<1x64xf32> to vector<8x64xf32>
    %172 = arith.addf %170, %171 : vector<8x64xf32>
    %c0_84 = arith.constant 0 : index
    %c0_85 = arith.constant 0 : index
    %173 = vector.load %arg23[%c0_84, %c0_85] : memref<8x64xf32, #tpu.memory_space<vmem>>, vector<8x64xf32>
    tpu.vector_store %arg23[%c0_84, %c0_85], %172 {strides = array<i32>} : memref<8x64xf32, #tpu.memory_space<vmem>>, vector<8x64xf32>,
    %c1_i32 = arith.constant 1 : i32
    %174 = arith.cmpi eq, %arg1, %c1_i32 : i32
    %175 = arith.extui %174 : i1 to i32
    %c0_i32_86 = arith.constant 0 : i32
    %176 = arith.cmpi ne, %175, %c0_i32_86 : i32
    scf.if %176 {
      %177 = vector.extract_strided_slice %172 {offsets = [0, 0], sizes = [1, 64], strides = [1, 1]} : vector<8x64xf32> to vector<1x64xf32>
      %c0_87 = arith.constant 0 : index
      %c0_88 = arith.constant 0 : index
      %178 = vector.load %arg18[%c0_87, %c0_88] : memref<64x64xf32, #tpu.memory_space<vmem>>, vector<64x64xf32>
      %cst_89 = arith.constant dense<0.000000e+00> : vector<1x64xf32>
      %179 = tpu.matmul %177, %178, %cst_89 {dimension_numbers = #tpu.dot_dimension_numbers<[1], [0], [0], [1], [0, 0, 1, 1], [], []>} : vector<1x64xf32>, vector<64x64xf32>, vector<1x64xf32> -> vector<1x64xf32>
      %c0_90 = arith.constant 0 : index
      %c0_91 = arith.constant 0 : index
      %180 = vector.load %arg19[%c0_90, %c0_91] : memref<1x64xf32, #tpu.memory_space<vmem>>, vector<1x64xf32>
      %181 = arith.addf %179, %180 : vector<1x64xf32>
      %182 = math.tanh %181 : vector<1x64xf32>
      %c0_92 = arith.constant 0 : index
      %c0_93 = arith.constant 0 : index
      %183 = vector.load %arg20[%c0_92, %c0_93] : memref<64x2xf32, #tpu.memory_space<vmem>>, vector<64x2xf32>
      %cst_94 = arith.constant dense<0.000000e+00> : vector<1x2xf32>
      %184 = tpu.matmul %182, %183, %cst_94 {dimension_numbers = #tpu.dot_dimension_numbers<[1], [0], [0], [1], [0, 0, 1, 1], [], []>} : vector<1x64xf32>, vector<64x2xf32>, vector<1x2xf32> -> vector<1x2xf32>
      %c0_95 = arith.constant 0 : index
      %c0_96 = arith.constant 0 : index
      %185 = vector.load %arg21[%c0_95, %c0_96] : memref<1x2xf32, #tpu.memory_space<vmem>>, vector<1x2xf32>
      %186 = arith.addf %184, %185 : vector<1x2xf32>
      %c0_97 = arith.constant 0 : index
      %c0_98 = arith.constant 0 : index
      %c0_99 = arith.constant 0 : index
      %187 = vector.load %arg22[%c0_97, %c0_98, %c0_99] : memref<1x1x2xf32, #tpu.memory_space<vmem>>, vector<1x1x2xf32>
      %188 = vector.shape_cast %187 : vector<1x1x2xf32> to vector<1x2xf32>
      %189 = vector.shape_cast %186 : vector<1x2xf32> to vector<1x1x2xf32>
      tpu.vector_store %arg22[%c0_97, %c0_98, %c0_99], %189 {strides = array<i32>} : memref<1x1x2xf32, #tpu.memory_space<vmem>>, vector<1x1x2xf32>,
    } else {
    }
    return
  }
  func.func @transform_0(%arg0: i32, %arg1: i32) -> (i32, i32) {
    %c0_i32 = arith.constant 0 : i32
    %c0_i32_0 = arith.constant 0 : i32
    return %arg0, %c0_i32 : i32, i32
  }
  func.func @transform_1(%arg0: i32, %arg1: i32) -> (i32, i32, i32) {
    %c0_i32 = arith.constant 0 : i32
    %c0_i32_0 = arith.constant 0 : i32
    %c0_i32_1 = arith.constant 0 : i32
    return %arg0, %c0_i32, %c0_i32_0 : i32, i32, i32
  }
  func.func @transform_2(%arg0: i32, %arg1: i32) -> (i32, i32) {
    %c0_i32 = arith.constant 0 : i32
    %c0_i32_0 = arith.constant 0 : i32
    %c0_i32_1 = arith.constant 0 : i32
    return %c0_i32, %c0_i32_0 : i32, i32
  }
  func.func @transform_3(%arg0: i32, %arg1: i32) -> (i32, i32) {
    %c0_i32 = arith.constant 0 : i32
    %c0_i32_0 = arith.constant 0 : i32
    %c0_i32_1 = arith.constant 0 : i32
    return %c0_i32, %c0_i32_0 : i32, i32
  }
  func.func @transform_4(%arg0: i32, %arg1: i32) -> (i32, i32, i32) {
    %c0_i32 = arith.constant 0 : i32
    %c0_i32_0 = arith.constant 0 : i32
    %c0_i32_1 = arith.constant 0 : i32
    return %arg1, %c0_i32, %c0_i32_0 : i32, i32, i32
  }
  func.func @transform_5(%arg0: i32, %arg1: i32) -> (i32, i32, i32) {
    %c0_i32 = arith.constant 0 : i32
    %c0_i32_0 = arith.constant 0 : i32
    %c0_i32_1 = arith.constant 0 : i32
    return %arg1, %c0_i32, %c0_i32_0 : i32, i32, i32
  }
  func.func @transform_6(%arg0: i32, %arg1: i32) -> (i32, i32, i32) {
    %c0_i32 = arith.constant 0 : i32
    %c0_i32_0 = arith.constant 0 : i32
    %c0_i32_1 = arith.constant 0 : i32
    return %arg1, %c0_i32, %c0_i32_0 : i32, i32, i32
  }
  func.func @transform_7(%arg0: i32, %arg1: i32) -> (i32, i32, i32) {
    %c0_i32 = arith.constant 0 : i32
    %c0_i32_0 = arith.constant 0 : i32
    %c0_i32_1 = arith.constant 0 : i32
    return %arg1, %c0_i32, %c0_i32_0 : i32, i32, i32
  }
  func.func @transform_8(%arg0: i32, %arg1: i32) -> (i32, i32, i32) {
    %c0_i32 = arith.constant 0 : i32
    %c0_i32_0 = arith.constant 0 : i32
    %c0_i32_1 = arith.constant 0 : i32
    return %arg1, %c0_i32, %c0_i32_0 : i32, i32, i32
  }
  func.func @transform_9(%arg0: i32, %arg1: i32) -> (i32, i32, i32) {
    %c0_i32 = arith.constant 0 : i32
    %c0_i32_0 = arith.constant 0 : i32
    %c0_i32_1 = arith.constant 0 : i32
    return %arg1, %c0_i32, %c0_i32_0 : i32, i32, i32
  }
  func.func @transform_10(%arg0: i32, %arg1: i32) -> (i32, i32, i32) {
    %c0_i32 = arith.constant 0 : i32
    %c0_i32_0 = arith.constant 0 : i32
    %c0_i32_1 = arith.constant 0 : i32
    return %arg1, %c0_i32, %c0_i32_0 : i32, i32, i32
  }
  func.func @transform_11(%arg0: i32, %arg1: i32) -> (i32, i32, i32) {
    %c0_i32 = arith.constant 0 : i32
    %c0_i32_0 = arith.constant 0 : i32
    %c0_i32_1 = arith.constant 0 : i32
    return %arg1, %c0_i32, %c0_i32_0 : i32, i32, i32
  }
  func.func @transform_12(%arg0: i32, %arg1: i32) -> (i32, i32, i32) {
    %c0_i32 = arith.constant 0 : i32
    %c0_i32_0 = arith.constant 0 : i32
    %c0_i32_1 = arith.constant 0 : i32
    return %arg1, %c0_i32, %c0_i32_0 : i32, i32, i32
  }
  func.func @transform_13(%arg0: i32, %arg1: i32) -> (i32, i32, i32) {
    %c0_i32 = arith.constant 0 : i32
    %c0_i32_0 = arith.constant 0 : i32
    %c0_i32_1 = arith.constant 0 : i32
    return %arg1, %c0_i32, %c0_i32_0 : i32, i32, i32
  }
  func.func @transform_14(%arg0: i32, %arg1: i32) -> (i32, i32, i32) {
    %c0_i32 = arith.constant 0 : i32
    %c0_i32_0 = arith.constant 0 : i32
    %c0_i32_1 = arith.constant 0 : i32
    return %arg1, %c0_i32, %c0_i32_0 : i32, i32, i32
  }
  func.func @transform_15(%arg0: i32, %arg1: i32) -> (i32, i32, i32) {
    %c0_i32 = arith.constant 0 : i32
    %c0_i32_0 = arith.constant 0 : i32
    %c0_i32_1 = arith.constant 0 : i32
    return %arg1, %c0_i32, %c0_i32_0 : i32, i32, i32
  }
  func.func @transform_16(%arg0: i32, %arg1: i32) -> (i32, i32) {
    %c0_i32 = arith.constant 0 : i32
    %c0_i32_0 = arith.constant 0 : i32
    %c0_i32_1 = arith.constant 0 : i32
    return %c0_i32, %c0_i32_0 : i32, i32
  }
  func.func @transform_17(%arg0: i32, %arg1: i32) -> (i32, i32) {
    %c0_i32 = arith.constant 0 : i32
    %c0_i32_0 = arith.constant 0 : i32
    %c0_i32_1 = arith.constant 0 : i32
    return %c0_i32, %c0_i32_0 : i32, i32
  }
  func.func @transform_18(%arg0: i32, %arg1: i32) -> (i32, i32) {
    %c0_i32 = arith.constant 0 : i32
    %c0_i32_0 = arith.constant 0 : i32
    %c0_i32_1 = arith.constant 0 : i32
    return %c0_i32, %c0_i32_0 : i32, i32
  }
  func.func @transform_19(%arg0: i32, %arg1: i32) -> (i32, i32) {
    %c0_i32 = arith.constant 0 : i32
    %c0_i32_0 = arith.constant 0 : i32
    %c0_i32_1 = arith.constant 0 : i32
    return %c0_i32, %c0_i32_0 : i32, i32
  }
  func.func @transform_20(%arg0: i32, %arg1: i32) -> (i32, i32, i32) {
    %c0_i32 = arith.constant 0 : i32
    %c0_i32_0 = arith.constant 0 : i32
    %c0_i32_1 = arith.constant 0 : i32
    return %arg0, %c0_i32, %c0_i32_0 : i32, i32, i32
  }
}

</mosaic_0001>

<bundles_post_ra>
// kernel: bert_cls_forward.1
= control target key start
LH: loop header
LB: loop body
LE: loop exit
PB: predicated region body
PF: predicated region fallthrough
CT: control target
= control target key end

     0   :  { %s3568_s0 = inlined_call_operand.vmem [shape: f32[16,64], index: 0, kind: input, shape index: {}]   ;;  %s3569_s1 = inlined_call_operand.vmem [shape: f32[2,1,8], index: 1, kind: input, shape index: {}]   ;;  %s3570_s2 = inlined_call_operand.vmem [shape: f32[1,64], index: 2, kind: input, shape index: {}]   ;;  %s3571_s3 = inlined_call_operand.vmem [shape: f32[1,64], index: 3, kind: input, shape index: {}]   ;;  %s3572_s4 = inlined_call_operand.vmem [shape: f32[2,64,192], index: 4, kind: input, shape index: {}]   ;;  %s3573_s5 = inlined_call_operand.vmem [shape: f32[2,1,192], index: 5, kind: input, shape index: {}]   ;;  %s3574_s6 = inlined_call_operand.vmem [shape: f32[2,64,64], index: 6, kind: input, shape index: {}]   ;;  %s3575_s7 = inlined_call_operand.vmem [shape: f32[2,1,64], index: 7, kind: input, shape index: {}]   ;;  %s3576_s8 = inlined_call_operand.vmem [shape: f32[2,1,64], index: 8, kind: input, shape index: {}]   ;;  %s3577_s9 = inlined_call_operand.vmem [shape: f32[2,1,64], index: 9, kind: input, shape index: {}]   ;;  %s3578_s10 = inlined_call_operand.vmem [shape: f32[2,64,256], index: 10, kind: input, shape index: {}]   ;;  %s3579_s11 = inlined_call_operand.vmem [shape: f32[2,1,256], index: 11, kind: input, shape index: {}]   ;;  %s3580_s12 = inlined_call_operand.vmem [shape: f32[2,256,64], index: 12, kind: input, shape index: {}]   ;;  %s3581_s13 = inlined_call_operand.vmem [shape: f32[2,1,64], index: 13, kind: input, shape index: {}]   ;;  %s3582_s14 = inlined_call_operand.vmem [shape: f32[2,1,64], index: 14, kind: input, shape index: {}]   ;;  %s3583_s15 = inlined_call_operand.vmem [shape: f32[2,1,64], index: 15, kind: input, shape index: {}]   ;;  %s3584_s16 = inlined_call_operand.vmem [shape: f32[64,64], index: 16, kind: input, shape index: {}]   ;;  %s3585_s17 = inlined_call_operand.vmem [shape: f32[1,64], index: 17, kind: input, shape index: {}]   ;;  %s3586_s18 = inlined_call_operand.vmem [shape: f32[64,2], index: 18, kind: input, shape index: {}]   ;;  %s3587_s19 = inlined_call_operand.vmem [shape: f32[1,2], index: 19, kind: input, shape index: {}]   ;;  %s3588_s20 = inlined_call_operand.hbm [shape: f32[2,1,2], index: 20, kind: output, shape index: {}]  }
   0x1   :  { %3605 = sst [smem:[#allocation21_spill]] %s3568_s0 }
   0x2   :  { %3606 = sst [smem:[#allocation22_spill]] %s3569_s1 }
   0x3   :  { %3607 = sst [smem:[#allocation23_spill]] %s3570_s2 }
   0x4   :  { %3608 = sst [smem:[#allocation24_spill]] %s3571_s3 }
   0x5   :  { %3609 = sst [smem:[#allocation25_spill]] %s3572_s4 }
   0x6   :  { %3610 = sst [smem:[#allocation26_spill]] %s3573_s5 }
   0x7   :  { %3611 = sst [smem:[#allocation27_spill]] %s3574_s6 }
   0x8   :  { %3612 = sst [smem:[#allocation28_spill]] %s3584_s16 }
   0x9   :  { %3613 = sst [smem:[#allocation29_spill]] %s3585_s17 }
   0xa   :  { %3614 = sst [smem:[#allocation30_spill]] %s3586_s18 }
   0xb   :  { %3615 = sst [smem:[#allocation31_spill]] %s3587_s19 }
   0xc   :  { %3616 = sst [smem:[#allocation32_spill]] %s3588_s20 }
   0xd   :  { %25 = vsyncpa [#allocation5], 0 }
   0xe   :  { %27 = vsyncpa [#allocation5 + $0x1], 0  ;;  %s3092_s1 = smov 0   ;;  %s3094_s22 = smov 0  }
   0xf   :  { %s3096_s23 = smov 0   ;;  %s3098_s24 = smov 0  }
  0x10   :  { %s3100_s2 = smov 0   ;;  %s3102_s25 = smov 0  }
  0x11   :  { %s3104_s3 = smov 0   ;;  %s3106_s26 = smov 0  }
  0x12 LB: > { %3617 = sst [smem:[#allocation7_spill]] %s2943_s1  ;;  %s2439_s27 = sadd.s32 4294967295, %s2971_s26   ;;  %s2971_s26 = sphi %s3106_s26, %s33_s26   ;;  %s2967_s3 = sphi %s3104_s3, %s3666_s3   ;;  %s2963_s25 = sphi %s3102_s25, %s3665_s25   ;;  %s2959_s2 = sphi %s3100_s2, %s3664_s2   ;;  %s2955_s24 = sphi %s3098_s24, %s3663_s24   ;;  %s2951_s23 = sphi %s3096_s23, %s3662_s23   ;;  %s2947_s22 = sphi %s3094_s22, %s3668_s22   ;;  %s2943_s1 = sphi %s3092_s1, %s3667_s1  }
  0x13   : > { %3618 = sst [smem:[#allocation8_spill]] %s2951_s23  ;;  %s2440_s28 = sadd.s32 4294967294, %s2971_s26  }
  0x14   : > { %3619 = sst [smem:[#allocation9_spill]] %s2955_s24  ;;  %s42_s4 = sadd.s32 1, %s2963_s25 }
  0x15   : > { %3620 = sst [smem:[#allocation10_spill]] %s2959_s2  ;;  %p43_p0 = scmp.ge.s32.totalorder %s42_s4, 2 }
  0x16   : > { %3621 = sst [smem:[#allocation11_spill]] %s2963_s25  ;;  %s45_s29 = sadd.s32 1, %s2967_s3 }
  0x17   : > { %3622 = sst [smem:[#allocation12_spill]] %s2967_s3  ;;  %p552_p1 = scmp.ne.s32.totalorder %s2951_s23, %s2947_s22 }
  0x18   : > { %3623 = sst [smem:[#allocation13_spill]] %s2971_s26  ;;  %p553_p2 = scmp.eq.s32.totalorder %s2439_s27, 3 }
  0x19   : > { %s3670_s4 = smov (%p43_p0, %s42_s4), 0  ;;  %s3672_s29 = smov (!%p43_p0, %s45_s29), %s2967_s3 }
  0x1a   : > { %3624 = sst [smem:[#allocation14_spill]] %s3670_s4  ;;  %p3141_p3 = por %p553_p2, %p552_p1 }
  0x1b   : > { %p558_p4 = scmp.ne.s32.totalorder %s2947_s22, %s2943_s1  ;;  %p47_p5 = scmp.ge.s32.totalorder %s3672_s29, 2 }
  0x1c   : > { %s3625_s30 = scalar_select %p3141_p3, 1, 0 }
  0x1d   : > { %p559_p6 = scmp.eq.s32.totalorder %s2440_s28, 3  ;;  %p2443_p7 = scmp.ge.s32.totalorder %s2971_s26, 1 }
  0x1e   : > { %3626 = sst [smem:[#allocation15_spill]] %s3625_s30  ;;  %p690_p8 = scmp.lt.s32.totalorder %s2971_s26, 5 }
  0x1f   : > { %s3674_s29 = smov (%p47_p5, %s3672_s29), 0  ;;  %p3151_p9 = por %p559_p6, %p558_p4 }
  0x20   : > { %3627 = sst [smem:[#allocation16_spill]] %s3674_s29  ;;  %p691_p10 = pnand %p2443_p7, %p690_p8 }
  0x21   : > { %s3628_s0 = scalar_select %p3151_p9, 1, 0 }
  0x22   : > { %s539_s21 = ssub.s32 %s2967_s3, %s3674_s29  ;;  %s542_s27 = sadd.s32 1, %s2951_s23 }
  0x23   : > { %3629 = sst [smem:[#allocation17_spill]] %s3628_s0  ;;  %p540_p11 = scmp.eq.s32.totalorder %s539_s21, 0 }
  0x24   : > { %694 = sbr.rel (%p691_p10) target bundleno = 3962 (0xf7a), region = 100 }
  0x25   : > { %s3159_s4 = scalar_select %p540_p11, %s2951_s23, %s542_s27  }
  0x27   : > { %3630 = sst [smem:[#allocation18_spill]] %s3159_s4 }
  0x2b   : > { %p795_p12 = scmp.lt.s32.totalorder %s2959_s2, 1  ;;  %p802_p13 = scmp.lt.s32.totalorder %s2955_s24, 1 }
  0x2c   : > { %s3631_s3 = sld [smem:[#allocation22_spill]]  ;;  %s3632_s0 = sld [smem:[#allocation21_spill]] }
  0x2d   : > { %s796_s25 = scalar_select %p795_p12, %s2959_s2, 1 }
  0x2e   : > { %s3166_s1 = scalar_select %p802_p13, %s2955_s24, 1 }
  0x2f   : > { %s2444_s21 = sshll.u32 %s796_s25, 3  ;;  %s3633_s19 = sld [smem:[#allocation25_spill]] }
  0x30   : > { %s2486_s20 = sshll.u32 %s3166_s1, 7  ;;  %s2447_s18 = sshll.u32 %s3166_s1, 1 }
  0x31   : > { %s3635_s5 = sld [smem:[#allocation26_spill]]  ;;  %s3637_s6 = sld [smem:[#allocation27_spill]] }
  0x32   : > { %s801_s4 = scalar_lea.vmem %s3631_s3, %s796_s25  ;;  %s798_s26 = scalar_lea.vmem %s3632_s0, %s2444_s21 }
  0x33   : > { %v3175_v0 = vld [vmem:[%s801_s4] ss:$0 sm:$0xff]  ;;  %s2487_s3 = sshll.u32 %s3166_s1, 6  ;;  %s3214_s0 = scalar_lea.vmem %s3579_s11, %s2447_s18 }
  0x34   : > { %s2489_s4 = sshll.u32 %s3166_s1, 8  ;;  %s841_s2 = scalar_lea.vmem %s3581_s13, %s3166_s1 }
  0x35   : > { %s3180_s17 = scalar_lea.vmem %s3633_s19, %s2486_s20  ;;  %s847_s23 = scalar_lea.vmem %s3583_s15, %s3166_s1 }
  0x36   : > { %3634 = sst [smem:[#allocation19_spill]] %s3180_s17  ;;  %s3224_s17 = scalar_lea.vmem %s3580_s12, %s2489_s4 }
  0x37   : > { %s3186_s25 = scalar_lea.vmem %s3635_s5, %s2447_s18  ;;  %s3192_s28 = scalar_lea.vmem %s3637_s6, %s2487_s3 }
  0x38   : > { %3636 = sst [smem:[#allocation20_spill]] %s3186_s25  ;;  %s3209_s25 = scalar_lea.vmem %s3578_s10, %s2486_s20 }
  0x39   : > { %s844_s5 = scalar_lea.vmem %s3582_s14, %s3166_s1  ;;  %s3638_s18 = sand.u32 1, %s2947_s22  }
  0x3a   : > { %s3236_s3 = scalar_lea.vmem [#allocation4], %s3638_s18  ;;  %s3639_s6 = sld [smem:[#allocation9_spill]] }
  0x40   : > { %p2455_p0 = scmp.ne.s32.totalorder %s3639_s6, 0 }
  0x41   : > { %v853_v1 = vld [vmem:[%s798_s26] sm:$0xff] (!%p2455_p0)  ;;  %vm856_vm0 = vcmask (!%p2455_p0), 523264   ;;  %s3640_s19 = sld [smem:[#allocation23_spill]] (!%p2455_p0)  ;;  %s3641_s4 = sld [smem:[#allocation24_spill]] (!%p2455_p0) }
  0x42   : > { %852 = sbr.rel (%p2455_p0) target bundleno = 380 (0x17c), region = 104  ;;  %v857_v2 = vsel (!%p2455_p0), %vm856_vm0, %v853_v1, 0.0 }
  0x43   : > { %858 = vadd.xlane.f32.xlu0 (!%p2455_p0), %v857_v2 }
  0x47   : > { %v2456_v12 = vld [vmem:[%s3640_s19] ss:$0 sm:$0xff] (!%p2455_p0) }
  0x48   : > { %v2457_v14 = vld [vmem:[%s3641_s4] ss:$0 sm:$0xff] (!%p2455_p0) }
  0xd0   : > { %v859_v3 = vpop.xlane.xlu0 %858 }
  0xd1   : > { %v861_v4 = vmul.f32 0.015625, %v859_v3 }
  0xd3   : > { %v862_v5 = vsub.f32 %v853_v1, %v861_v4 }
  0xd5   : > { %v863_v6 = vmul.f32 %v862_v5, %v862_v5 }
  0xd7   : > { %v864_v7 = vsel %vm856_vm0, %v863_v6, 0.0 }
  0xd8   : > { %865 = vadd.xlane.f32.xlu0 %v864_v7 }
 0x165   : > { %v866_v8 = vpop.xlane.xlu0 %865 }
 0x166   : > { %v867_v9 = vmul.f32 0.015625, %v866_v8 }
 0x168   : > { %v868_v10 = vadd.f32 1e-12, %v867_v9 }
 0x16a   : > { %2849 = vrsqrt.f32 %v868_v10 }
 0x174   : > { %v2850_v11 = vpop.eup %2849 }
 0x175   : > { %v870_v13 = vmul.f32 %v2850_v11, %v862_v5 }
 0x177   : > { %v877_v15 = vmul.f32 %v2456_v12, %v870_v13 }
 0x179   : > { %v884_v16 = vadd.f32 %v2457_v14, %v877_v15 }
 0x17b   : > { %885 = vst.msk [vmem:[#allocation2] sm:$0xff] %vm856_vm0, %v884_v16 }
 0x17c PF: > { %s3642_s21 = sld [smem:[#allocation19_spill]]  ;;  %v2973_v24 = vmov 0.0   ;;  %s3643_s30 = sld [smem:[#allocation20_spill]]  ;;  %vm915_vm1 = vcmask 523264   ;;  %v905_v43 = vlaneseq  ;;  %vm2974_vm2 = vmmov 0  }
 0x17d   : > { %983 = vmatprep.mubr.f32.mxu1 %v2973_v24  ;;  %2588 = vmatprep.subr.mxu0 %v2973_v24  ;;  %s2975_s24 = smov 48   ;;  %s2976_s20 = smov 64   ;;  %vm993_vm3 = vcmask 130048   ;;  %vm1076_vm4 = vcmask 64512   ;;  %vm1334_vm5 = vcmask 261248   ;;  %vm1507_vm6 = vcmask 392448  }
 0x17e   : > { %v3271_v44 = vshrl.u32 %v905_v43, 7  ;;  %2590 = vmatprep.mubr.msk.f32.mxu0 %vm2974_vm2, %v2973_v24  ;;  %s2977_s29 = smov 112   ;;  %s2978_s18 = smov 32   ;;  %vm1680_vm7 = vcmask 523648  }
 0x17f   : > { %s2979_s27 = smov 96   ;;  %s2980_s6 = smov 80  }
 0x180   : > { %v907_v45 = vsub.s32 0, %v3271_v44  ;;  %v911_v51 = vsub.s32 1, %v3271_v44  ;;  %s2981_s19 = smov 16   ;;  %s3644_s16 = scalar_lea.vmem %s3575_s7, %s3166_s1 }
 0x182   : > { %v888_v17 = vld [vmem:[%s3642_s21 + $0x8] sm:$0xff]  ;;  %v890_v18 = vld [vmem:[%s3642_s21 + $0x18] sm:$0xff]  ;;  %v887_v19 = vld [vmem:[%s3642_s21] sm:$0xff] }
 0x183   : > { %v2665_v20 = vpack.c.bf16 %v890_v18, %v888_v17  ;;  %v889_v21 = vld [vmem:[%s3642_s21 + $0x10] sm:$0xff]  ;;  %v892_v22 = vld [vmem:[%s3642_s21 + $0x28] sm:$0xff]  ;;  %v894_v23 = vld [vmem:[%s3642_s21 + $0x38] sm:$0xff] }
 0x184   : > { %v2667_v25 = vpack.c.bf16 %v889_v21, %v887_v19  ;;  %v2669_v26 = vpack.c.bf16 %v894_v23, %v892_v22  ;;  %v891_v27 = vld [vmem:[%s3642_s21 + $0x20] sm:$0xff]  ;;  %v893_v28 = vld [vmem:[%s3642_s21 + $0x30] sm:$0xff]  ;;  %v896_v29 = vld [vmem:[%s3642_s21 + $0x48] sm:$0xff] }
 0x185   : > { %2666 = vmatprep.subr.bf16.mxu1 %v2665_v20  ;;  %v898_v30 = vld [vmem:[%s3642_s21 + $0x58] sm:$0xff]  ;;  %v2671_v31 = vpack.c.bf16 %v893_v28, %v891_v27  ;;  %v895_v33 = vld [vmem:[%s3642_s21 + $0x40] sm:$0xff]  ;;  %v897_v34 = vld [vmem:[%s3642_s21 + $0x50] sm:$0xff] }
 0x186   : > { %2668 = vmatpush1.bf16.msra.mxu1 %v2667_v25  ;;  %v2673_v32 = vpack.c.bf16 %v898_v30, %v896_v29  ;;  %v900_v35 = vld [vmem:[%s3642_s21 + $0x68] sm:$0xff]  ;;  %v902_v36 = vld [vmem:[%s3642_s21 + $0x78] sm:$0xff]  ;;  %v2675_v37 = vpack.c.bf16 %v897_v34, %v895_v33  ;;  %v899_v39 = vld [vmem:[%s3642_s21 + $0x60] sm:$0xff] }
 0x187   : > { %2670 = vmatprep.subr.bf16.mxu1 %v2669_v26  ;;  %v2677_v38 = vpack.c.bf16 %v902_v36, %v900_v35  ;;  %v901_v40 = vld [vmem:[%s3642_s21 + $0x70] sm:$0xff]  ;;  %v3266_v42 = vld [vmem:[#allocation2] sm:$0xff]  ;;  %s3645_s21 = scalar_lea.vmem %s3576_s8, %s3166_s1 }
 0x188   : > { %v2679_v41 = vpack.c.bf16 %v901_v40, %v899_v39  ;;  %v903_v46 = vld [vmem:[%s3643_s30] sm:$0x3] }
 0x189   : > { %v908_v47 = vrot.slane %v903_v46, %v907_v45  ;;  %v912_v52 = vrot.slane %v903_v46, %v911_v51 }
 0x18a   : > { %2672 = vmatpush1.bf16.msra.mxu1 %v2671_v31 }
 0x18b   : > { %2674 = vmatprep.subr.bf16.mxu1 %v2673_v32 }
 0x18e   : > { %2676 = vmatpush1.bf16.msra.mxu1 %v2675_v37 }
 0x18f   : > { %2678 = vmatprep.subr.bf16.mxu1 %v2677_v38 }
 0x192   : > { %2680 = vmatpush1.bf16.msra.mxu1 %v2679_v41 }
 0x193   : > { %2568 = vmatprep.subr.mxu1 %v2973_v24 }
 0x195   : > { %2458 = vmatmul.mubr.msk.f32.vlgmr.msra.gmra.mrb[0].mxu1 %vm915_vm1, %v3266_v42 }
 0x196   : > { %2570 = vmatprep.mubr.msk.f32.mxu1 %vm2974_vm2, %v2973_v24 }
 0x268   : > { %v985_v48 = vpop.f32.mrb[0].mxu1 }
 0x269   : > { %v986_v49 = vadd.f32 %v985_v48, %v908_v47  ;;  %v987_v50 = vpop.f32.mrb[1].mxu1 }
 0x26a   : > { %v3290_v55 = vadd.f32 %v987_v50, %v912_v52 }
 0x26b   : > { %1164 = vrot.lane.b32.xlu1 %v986_v49, %s2975_s24  ;;  %991 = vrot.lane.b32.xlu0 %v986_v49, %s2976_s20  ;;  %s3646_s20 = scalar_lea.vmem %s3577_s9, %s3166_s1 }
 0x26f   : > { %1162 = vrot.lane.b32.xlu1 %v986_v49, %s2977_s29 }
 0x273   : > { %1338 = vrot.lane.b32.xlu1 %v986_v49, %s2978_s18 }
 0x277   : > { %1336 = vrot.lane.b32.xlu1 %v986_v49, %s2979_s27 }
 0x2dd   : > { %v1165_v53 = vpop.permute.xlu1 %1164  ;;  %v992_v54 = vpop.permute.xlu0 %991 }
 0x2de   : > { %2569 = vmatpush3.xpose.msk.msra.mxu1 %vm993_vm3, %v992_v54 }
 0x2df   : > { %2573 = vmatprep.subr.mxu1 %v2973_v24 }
 0x2e1   : > { %v1163_v56 = vpop.permute.xlu1 %1162  ;;  %2571 = vmatmul.mubr.msk.f32.vlgmr.msra.gmra.mrb[2].mxu1 %vm993_vm3, %v986_v49 }
 0x2e2   : > { %2574 = vmatpush3.msra.mxu1 %v3290_v55  ;;  %2575 = vmatprep.mubr.msk.f32.mxu1 %vm2974_vm2, %v2973_v24 }
 0x2e3   : > { %2578 = vmatprep.subr.mxu1 %v2973_v24 }
 0x2e5   : > { %v1339_v57 = vpop.permute.xlu1 %1338 }
 0x2e6   : > { %2589 = vmatpush3.xpose.msk.msra.mxu0 %vm993_vm3, %v1339_v57 }
 0x2e7   : > { %2598 = vmatprep.subr.mxu0 %v2973_v24 }
 0x2e9   : > { %v1337_v58 = vpop.permute.xlu1 %1336 }
 0x2ea   : > { %2591 = vmatmul.mubr.msk.f32.vlgmr.msra.gmra.mrb[0].mxu0 %vm993_vm3, %v1337_v58 }
 0x2eb   : > { %2600 = vmatprep.mubr.msk.f32.mxu0 %vm2974_vm2, %v2973_v24 }
 0x3b4   : > { %v1064_v59 = vpop.f32.mrb[2].mxu1 }
 0x3b5   : > { %v1068_v60 = vmul.f32 0.25, %v1064_v59  ;;  %v2572_v61 = vpop.f32.mrb[3].mxu1  ;;  %v1683_v59 = vld [vmem:[%s3192_s28] sm:$0xff] }
 0x3b7   : > { %v1075_v62 = vadd.f32 %v3175_v0, %v1068_v60  ;;  %v1684_v60 = vld [vmem:[%s3192_s28 + $0x8] sm:$0xff] }
 0x3b8   : > { %v2682_v61 = vpack.c.bf16 %v1684_v60, %v1683_v59  ;;  %v1915_v60 = vld [vmem:[%s3224_s17 + $0x8] sm:$0xff] }
 0x3b9   : > { %v1077_v63 = vsel %vm1076_vm4, %v1075_v62, -inf }
 0x3ba   : > { %1078 = vmax.xlane.f32.xlu0 %v1077_v63  ;;  %v1685_v63 = vld [vmem:[%s3192_s28 + $0x10] sm:$0xff] }
 0x3bd   : > { %v1410_v1 = vpop.f32.mrb[0].mxu0 }
 0x3be   : > { %v2592_v2 = vpop.f32.mrb[1].mxu0  ;;  %v1414_v3 = vmul.f32 0.25, %v1410_v1  ;;  %v1686_v1 = vld [vmem:[%s3192_s28 + $0x18] sm:$0xff] }
 0x3bf   : > { %v2685_v2 = vpack.c.bf16 %v1686_v1, %v1685_v63 }
 0x3c0   : > { %v1415_v4 = vadd.f32 %v3175_v0, %v1414_v3  ;;  %v1687_v3 = vld [vmem:[%s3192_s28 + $0x20] sm:$0xff] }
 0x3c2   : > { %v1416_v5 = vsel %vm1076_vm4, %v1415_v4, -inf }
 0x3d0   : > { %1509 = vrot.lane.b32.xlu0 %v986_v49, %s2980_s6 }
 0x3ef   : > { %1417 = vmax.xlane.f32.xlu0 %v1416_v5 }
 0x405   : > { %1254 = vrot.lane.b32.xlu0 %v3290_v55, %s2977_s29 }
 0x447   : > { %v1079_v6 = vpop.xlane.xlu0 %1078 }
 0x448   : > { %v1080_v7 = vsub.f32 %v1075_v62, %v1079_v6  ;;  %v2982_v62 = vmov 0.0|0.0   ;;  %v1689_v6 = vld [vmem:[%s3192_s28 + $0x30] sm:$0xff] }
 0x44a   : > { %v1081_v8 = vmul.f32 1.442695, %v1080_v7  ;;  %v1690_v7 = vld [vmem:[%s3192_s28 + $0x38] sm:$0xff] }
 0x44b   : > { %v1510_v13 = vpop.permute.xlu0 %1509 }
 0x44c   : > { %2851 = vpow2.f32 %v1081_v8 }
 0x456   : > { %v2852_v9 = vpop.eup %2851 }
 0x457   : > { %v1083_v10 = vsel %vm1076_vm4, %v2852_v9, 0.0 }
 0x458   : > { %1084 = vadd.xlane.f32.xlu1 %v1083_v10 }
 0x469   : > { %1511 = vrot.lane.b32.xlu1 %v986_v49, %s2981_s19 }
 0x47c   : > { %v1418_v15 = vpop.xlane.xlu0 %1417 }
 0x47d   : > { %v1419_v20 = vsub.f32 %v1415_v4, %v1418_v15  ;;  %v1688_v4 = vld [vmem:[%s3192_s28 + $0x28] sm:$0xff] }
 0x47e   : > { %v2688_v5 = vpack.c.bf16 %v1688_v4, %v1687_v3  ;;  %v1917_v3 = vld [vmem:[%s3224_s17 + $0x18] sm:$0xff]  ;;  %v1934_v4 = vld [vmem:[%s3224_s17 + $0xa0] sm:$0xff] }
 0x47f   : > { %v1420_v21 = vmul.f32 1.442695, %v1419_v20 }
 0x480   : > { %v1255_v17 = vpop.permute.xlu0 %1254 }
 0x4e5   : > { %v1085_v11 = vpop.xlane.xlu1 %1084 }
 0x4e6   : > { %2853 = vrcp.f32 %v1085_v11 }
 0x4e7   : > { %2855 = vpow2.f32 %v1420_v21 }
 0x4e9   : > { %v1512_v12 = vpop.permute.xlu1 %1511 }
 0x4ea   : > { %2599 = vmatpush3.xpose.msk.msra.mxu0 %vm993_vm3, %v1512_v12 }
 0x4eb   : > { %2681 = vmatprep.subr.bf16.mxu0 %v2982_v62 }
 0x4ed   : > { %2601 = vmatmul.mubr.msk.f32.vlgmr.msra.gmra.mrb[2].mxu0 %vm993_vm3, %v1510_v13 }
 0x4ee   : > { %2624 = vmatprep.mubr.msk.f32.mxu0 %vm2974_vm2, %v2973_v24  ;;  %2683 = vmatpush3.bf16.msra.mxu0 %v2682_v61  ;;  %v1932_v61 = vld [vmem:[%s3224_s17 + $0x90] sm:$0xff] }
 0x4ef   : > { %2684 = vmatprep.subr.bf16.mxu0 %v2982_v62 }
 0x4f0   : > { %v2854_v14 = vpop.eup %2853 }
 0x4f1   : > { %v1087_v16 = vmul.f32 %v2854_v14, %v2852_v9  ;;  %v2856_v33 = vpop.eup %2855 }
 0x4f2   : > { %v1422_v34 = vsel %vm1076_vm4, %v2856_v33, 0.0  ;;  %2686 = vmatpush3.bf16.msra.mxu0 %v2685_v2  ;;  %v1916_v2 = vld [vmem:[%s3224_s17 + $0x10] sm:$0xff] }
 0x4f3   : > { %2576 = vmatmul.mubr.msk.f32.vlgmr.msra.gmra.mrb[4].mxu1 %vm1076_vm4, %v1087_v16  ;;  %2687 = vmatprep.subr.bf16.mxu0 %v2982_v62 }
 0x4f4   : > { %2579 = vmatpush3.xpose.msk.msra.mxu1 %vm993_vm3, %v1165_v53  ;;  %2580 = vmatprep.mubr.msk.f32.mxu1 %vm2974_vm2, %v2973_v24 }
 0x4f5   : > { %2583 = vmatprep.subr.mxu1 %v2973_v24 }
 0x4f6   : > { %2689 = vmatpush3.bf16.msra.mxu0 %v2688_v5  ;;  %v1935_v5 = vld [vmem:[%s3224_s17 + $0xa8] sm:$0xff] }
 0x4f7   : > { %2581 = vmatmul.mubr.msk.f32.vlgmr.msra.gmra.mrb[6].mxu1 %vm993_vm3, %v1163_v56  ;;  %2690 = vmatprep.subr.bf16.mxu0 %v2982_v62  ;;  %v1933_v62 = vld [vmem:[%s3224_s17 + $0x98] sm:$0xff] }
 0x4f8   : > { %2584 = vmatpush3.msra.mxu1 %v1255_v17  ;;  %2585 = vmatprep.mubr.msk.f32.mxu1 %vm2974_vm2, %v2973_v24  ;;  %v2713_v1 = vpack.c.bf16 %v1933_v62, %v1932_v61 }
 0x4f9   : > { %2593 = vmatprep.subr.mxu1 %v2973_v24 }
 0x5c0   : > { %v1583_v18 = vpop.f32.mrb[2].mxu0 }
 0x5c1   : > { %v2602_v19 = vpop.f32.mrb[3].mxu0  ;;  %v1587_v26 = vmul.f32 0.25, %v1583_v18  ;;  %v2472_v18 = vld [vmem:[%s3644_s16] ss:$0 sm:$0xff] }
 0x5c3   : > { %v1588_v30 = vadd.f32 %v3175_v0, %v1587_v26 }
 0x5c5   : > { %v1589_v32 = vsel %vm1076_vm4, %v1588_v30, -inf }
 0x5c6   : > { %v1157_v22 = vpop.f32.mrb[4].mxu1 }
 0x5c7   : > { %1161 = vst.msk [vmem:[#allocation3] sm:$0xff] %vm993_vm3, %v1157_v22  ;;  %v2577_v23 = vpop.f32.mrb[5].mxu1 }
 0x5ca   : > { %v1236_v25 = vpop.f32.mrb[6].mxu1 }
 0x5cb   : > { %v1240_v27 = vmul.f32 0.25, %v1236_v25  ;;  %v2582_v28 = vpop.f32.mrb[7].mxu1 }
 0x5cd   : > { %v1241_v29 = vadd.f32 %v3175_v0, %v1240_v27 }
 0x5cf   : > { %v1242_v31 = vsel %vm1076_vm4, %v1241_v29, -inf }
 0x5d0   : > { %1243 = vmax.xlane.f32.xlu1 %v1242_v31 }
 0x5d4   : > { %1590 = vmax.xlane.f32.xlu1 %v1589_v32  ;;  %v1802_v32 = vld [vmem:[%s3209_s25] sm:$0xff] }
 0x5d8   : > { %1423 = vadd.xlane.f32.xlu1 %v1422_v34 }
 0x65d   : > { %v1244_v35 = vpop.xlane.xlu1 %1243 }
 0x65e   : > { %v1245_v0 = vsub.f32 %v1241_v29, %v1244_v35  ;;  %v1807_v35 = vld [vmem:[%s3209_s25 + $0x28] sm:$0xff] }
 0x660   : > { %v1246_v41 = vmul.f32 1.442695, %v1245_v0  ;;  %v1811_v0 = vld [vmem:[%s3209_s25 + $0x48] sm:$0xff] }
 0x661   : > { %v1591_v36 = vpop.xlane.xlu1 %1590 }
 0x662   : > { %v1592_v37 = vsub.f32 %v1588_v30, %v1591_v36  ;;  %v1803_v30 = vld [vmem:[%s3209_s25 + $0x8] sm:$0xff]  ;;  %v1809_v36 = vld [vmem:[%s3209_s25 + $0x38] sm:$0xff] }
 0x664   : > { %v1593_v38 = vmul.f32 1.442695, %v1592_v37  ;;  %v2697_v37 = vpack.c.bf16 %v1809_v36, %v1807_v35  ;;  %v1925_v35 = vld [vmem:[%s3224_s17 + $0x58] sm:$0xff] }
 0x665   : > { %v1424_v47 = vpop.xlane.xlu1 %1423 }
 0x666   : > { %2857 = vpow2.f32 %v1593_v38  ;;  %v1806_v38 = vld [vmem:[%s3209_s25 + $0x20] sm:$0xff] }
 0x667   : > { %2859 = vpow2.f32 %v1246_v41  ;;  %v1813_v41 = vld [vmem:[%s3209_s25 + $0x58] sm:$0xff] }
 0x670   : > { %v2858_v39 = vpop.eup %2857 }
 0x671   : > { %v1595_v40 = vsel %vm1076_vm4, %v2858_v39, 0.0  ;;  %v2860_v43 = vpop.eup %2859 }
 0x672   : > { %1596 = vadd.xlane.f32.xlu1 %v1595_v40  ;;  %v1248_v46 = vsel %vm1076_vm4, %v2860_v43, 0.0 }
 0x683   : > { %1427 = vrot.lane.b32.xlu1 %v3290_v55, %s2979_s27 }
 0x6a7   : > { %1249 = vadd.xlane.f32.xlu1 %v1248_v46  ;;  %v1810_v46 = vld [vmem:[%s3209_s25 + $0x40] sm:$0xff] }
 0x6b8   : > { %1600 = vrot.lane.b32.xlu1 %v3290_v55, %s2980_s6  ;;  %s3647_s6 = sld [smem:[#allocation9_spill]] }
 0x6be   : > { %p2480_p1 = scmp.ne.s32.totalorder %s3647_s6, 1 }
 0x6bf   : > { %s3648_s26 = sld [smem:[#allocation28_spill]] (!%p2480_p1)  ;;  %vm2984_vm8 = vmmov (!%p2480_p1), 0   ;;  %s3651_s6 = sld [smem:[#allocation29_spill]] (!%p2480_p1)  ;;  %vm2223_vm9 = vcmask (!%p2480_p1), 8192  }
 0x6c5   : > { %s3649_s16 = smov (!%p2480_p1), %s3648_s26 }
 0x6ff   : > { %v1597_v48 = vpop.xlane.xlu1 %1596 }
 0x703   : > { %v1428_v49 = vpop.permute.xlu1 %1427 }
 0x734   : > { %v1250_v50 = vpop.xlane.xlu1 %1249 }
 0x735   : > { %2861 = vrcp.f32 %v1250_v50  ;;  %v1817_v50 = vld [vmem:[%s3209_s25 + $0x78] sm:$0xff] }
 0x736   : > { %2863 = vrcp.f32 %v1424_v47  ;;  %v1812_v47 = vld [vmem:[%s3209_s25 + $0x50] sm:$0xff] }
 0x737   : > { %2865 = vrcp.f32 %v1597_v48  ;;  %v2703_v48 = vpack.c.bf16 %v1812_v47, %v1810_v46  ;;  %v1945_v46 = vld [vmem:[%s3224_s17 + $0xf8] sm:$0xff] }
 0x738   : > { %v1601_v57 = vpop.permute.xlu1 %1600 }
 0x73f   : > { %v2862_v52 = vpop.eup %2861 }
 0x740   : > { %v1252_v53 = vmul.f32 %v2862_v52, %v2860_v43  ;;  %v2864_v54 = vpop.eup %2863  ;;  %v2701_v43 = vpack.c.bf16 %v1813_v41, %v1811_v0  ;;  %v1814_v52 = vld [vmem:[%s3209_s25 + $0x60] sm:$0xff]  ;;  %v1927_v0 = vld [vmem:[%s3224_s17 + $0x68] sm:$0xff] }
 0x741   : > { %v1426_v56 = vmul.f32 %v2864_v54, %v2856_v33  ;;  %v2866_v55 = vpop.eup %2865  ;;  %v1804_v33 = vld [vmem:[%s3209_s25 + $0x10] sm:$0xff] }
 0x742   : > { %2586 = vmatmul.mubr.msk.f32.vlgmr.msra.gmra.mrb[8].mxu1 %vm1076_vm4, %v1252_v53  ;;  %v1599_v58 = vmul.f32 %v2866_v55, %v2858_v39  ;;  %v2695_v34 = vpack.c.bf16 %v1804_v33, %v1802_v32  ;;  %v1808_v39 = vld [vmem:[%s3209_s25 + $0x30] sm:$0xff]  ;;  %v1930_v55 = vld [vmem:[%s3224_s17 + $0x80] sm:$0xff]  ;;  %v1941_v32 = vld [vmem:[%s3224_s17 + $0xd8] sm:$0xff] }
 0x743   : > { %2594 = vmatpush3.msra.mxu1 %v1428_v49  ;;  %2595 = vmatprep.mubr.msk.f32.mxu1 %vm2974_vm2, %v2973_v24  ;;  %v2699_v40 = vpack.c.bf16 %v1808_v39, %v1806_v38  ;;  %v1815_v49 = vld [vmem:[%s3209_s25 + $0x68] sm:$0xff]  ;;  %v1816_v54 = vld [vmem:[%s3209_s25 + $0x70] sm:$0xff] }
 0x744   : > { %2603 = vmatprep.subr.mxu1 %v2973_v24  ;;  %v2705_v53 = vpack.c.bf16 %v1817_v50, %v1815_v49  ;;  %v1943_v38 = vld [vmem:[%s3224_s17 + $0xe8] sm:$0xff]  ;;  %v1929_v49 = vld [vmem:[%s3224_s17 + $0x78] sm:$0xff] }
 0x746   : > { %2596 = vmatmul.mubr.msk.f32.vlgmr.msra.gmra.mrb[10].mxu1 %vm1076_vm4, %v1426_v56  ;;  %v2707_v56 = vpack.c.bf16 %v1816_v54, %v1814_v52  ;;  %v1818_v52 = vld [vmem:[%s3214_s0] sm:$0x3] }
 0x747   : > { %2604 = vmatpush3.msra.mxu1 %v1601_v57  ;;  %2605 = vmatprep.mubr.msk.f32.mxu1 %vm2974_vm2, %v2973_v24  ;;  %v1931_v57 = vld [vmem:[%s3224_s17 + $0x88] sm:$0xff]  ;;  %v1827_v54 = vrot.slane %v1818_v52, %v911_v51  ;;  %v2477_v51 = vld [vmem:[%s841_s2] ss:$0 sm:$0xff] }
 0x748   : > { %v2709_v59 = vpack.c.bf16 %v1931_v57, %v1930_v55 }
 0x74a   : > { %2606 = vmatmul.mubr.msk.f32.vlgmr.msra.gmra.mrb[12].mxu1 %vm1076_vm4, %v1599_v58  ;;  %v1914_v58 = vld [vmem:[%s3224_s17] sm:$0xff] }
 0x74b   : > { %1897 = vmatprep.mubr.f32.mxu1 %v2973_v24  ;;  %v2691_v24 = vpack.c.bf16 %v1690_v7, %v1689_v6  ;;  %v2711_v63 = vpack.c.bf16 %v1915_v60, %v1914_v58  ;;  %v2715_v6 = vpack.c.bf16 %v1917_v3, %v1916_v2  ;;  %v2717_v7 = vpack.c.bf16 %v1935_v5, %v1934_v4 }
 0x74d   : > { %2692 = vmatpush3.bf16.msra.mxu0 %v2691_v24  ;;  %v1918_v24 = vld [vmem:[%s3224_s17 + $0x20] sm:$0xff] }
 0x74e   : > { %2710 = vmatprep.subr.bf16.mxu0 %v2709_v59 }
 0x815   : > { %v1326_v8 = vpop.f32.mrb[8].mxu1 }
 0x816   : > { %1331 = vrot.lane.b32.xlu0 %v1326_v8, %s2981_s19  ;;  %v2587_v9 = vpop.f32.mrb[9].mxu1  ;;  %v1919_v8 = vld [vmem:[%s3224_s17 + $0x28] sm:$0xff] }
 0x817   : > { %v2719_v9 = vpack.c.bf16 %v1919_v8, %v1918_v24 }
 0x819   : > { %v1499_v10 = vpop.f32.mrb[10].mxu1 }
 0x81a   : > { %1504 = vrot.lane.b32.xlu1 %v1499_v10, %s2978_s18  ;;  %v2597_v11 = vpop.f32.mrb[11].mxu1 }
 0x81d   : > { %v1672_v12 = vpop.f32.mrb[12].mxu1 }
 0x81e   : > { %1677 = vrot.lane.b32.xlu0 %v1672_v12, %s2975_s24  ;;  %v2607_v13 = vpop.f32.mrb[13].mxu1 }
 0x888   : > { %v1332_v14 = vpop.permute.xlu0 %1331 }
 0x889   : > { %1335 = vst.msk [vmem:[#allocation3] sm:$0xff] %vm1334_vm5, %v1332_v14  ;;  %v2474_v14 = vld [vmem:[%s3645_s21] ss:$0 sm:$0xff] }
 0x88c   : > { %v1505_v15 = vpop.permute.xlu1 %1504 }
 0x88d   : > { %1508 = vst.msk [vmem:[#allocation3] sm:$0xff] %vm1507_vm6, %v1505_v15 }
 0x890   : > { %v1678_v16 = vpop.permute.xlu0 %1677 }
 0x891   : > { %1681 = vst.msk [vmem:[#allocation3] sm:$0xff] %vm1680_vm7, %v1678_v16  ;;  %v2475_v16 = vld [vmem:[%s3646_s20] ss:$0 sm:$0xff]  ;;  %s3650_s20 = sld [smem:[#allocation30_spill]] (!%p2480_p1) }
 0x898   : > { %v1682_v17 = vld [vmem:[#allocation3] sm:$0xff] }
 0x899   : > { %2625 = vmatmul.mubr.msk.f32.vlgmr.msra.gmra.mrb[4].mxu0 %vm915_vm1, %v1682_v17 }
 0x89a   : > { %2712 = vmatpush3.bf16.msra.mxu0 %v2711_v63 }
 0x89b   : > { %2714 = vmatprep.subr.bf16.mxu0 %v2713_v1 }
 0x89e   : > { %2716 = vmatpush3.bf16.msra.mxu0 %v2715_v6 }
 0x89f   : > { %2718 = vmatprep.subr.bf16.mxu0 %v2717_v7 }
 0x8a2   : > { %2720 = vmatpush3.bf16.msra.mxu0 %v2719_v9 }
 0x96c   : > { %v1767_v19 = vpop.f32.mrb[4].mxu0 }
 0x96d   : > { %v1768_v20 = vadd.f32 %v2472_v18, %v1767_v19  ;;  %v2626_v21 = vpop.f32.mrb[5].mxu0  ;;  %v1936_v19 = vld [vmem:[%s3224_s17 + $0xb0] sm:$0xff] }
 0x96f   : > { %v1771_v22 = vadd.f32 %v1768_v20, %v3266_v42  ;;  %v1805_v42 = vld [vmem:[%s3209_s25 + $0x18] sm:$0xff] }
 0x970   : > { %v2693_v31 = vpack.c.bf16 %v1805_v42, %v1803_v30  ;;  %v1937_v20 = vld [vmem:[%s3224_s17 + $0xb8] sm:$0xff]  ;;  %v1923_v30 = vld [vmem:[%s3224_s17 + $0x48] sm:$0xff] }
 0x971   : > { %v1774_v23 = vsel %vm915_vm1, %v1771_v22, 0.0  ;;  %v2721_v21 = vpack.c.bf16 %v1937_v20, %v1936_v19  ;;  %v2479_v20 = vld [vmem:[%s847_s23] ss:$0 sm:$0xff] }
 0x972   : > { %1775 = vadd.xlane.f32.xlu1 %v1774_v23  ;;  %2694 = vmatprep.subr.bf16.mxu1 %v2693_v31  ;;  %v1921_v23 = vld [vmem:[%s3224_s17 + $0x38] sm:$0xff]  ;;  %v1940_v31 = vld [vmem:[%s3224_s17 + $0xd0] sm:$0xff] }
 0x973   : > { %2696 = vmatpush1.bf16.msra.mxu1 %v2695_v34  ;;  %2722 = vmatprep.subr.bf16.mxu0 %v2721_v21  ;;  %v2729_v33 = vpack.c.bf16 %v1941_v32, %v1940_v31  ;;  %v1924_v34 = vld [vmem:[%s3224_s17 + $0x50] sm:$0xff]  ;;  %v2142_v32 = vld [vmem:[%s3650_s20 + $0x8] sm:$0xff] (!%p2480_p1) }
 0x974   : > { %2698 = vmatprep.subr.bf16.mxu1 %v2697_v37  ;;  %v2731_v36 = vpack.c.bf16 %v1925_v35, %v1924_v34  ;;  %v1942_v37 = vld [vmem:[%s3224_s17 + $0xe0] sm:$0xff]  ;;  %v2063_v34 = vld [vmem:[%s3649_s16 + $0x28] sm:$0xff] (!%p2480_p1) }
 0x975   : > { %v2733_v39 = vpack.c.bf16 %v1943_v38, %v1942_v37  ;;  %v2064_v37 = vld [vmem:[%s3649_s16 + $0x30] sm:$0xff] (!%p2480_p1)  ;;  %v2065_v38 = vld [vmem:[%s3649_s16 + $0x38] sm:$0xff] (!%p2480_p1) }
 0x977   : > { %2700 = vmatpush1.bf16.msra.mxu1 %v2699_v40  ;;  %v1926_v40 = vld [vmem:[%s3224_s17 + $0x60] sm:$0xff] }
 0x978   : > { %2702 = vmatprep.subr.bf16.mxu1 %v2701_v43  ;;  %v2735_v41 = vpack.c.bf16 %v1927_v0, %v1926_v40  ;;  %v1944_v43 = vld [vmem:[%s3224_s17 + $0xf0] sm:$0xff]  ;;  %v2144_v0 = vld [vmem:[%s3650_s20 + $0x18] sm:$0xff] (!%p2480_p1) }
 0x979   : > { %v2737_v47 = vpack.c.bf16 %v1945_v46, %v1944_v43  ;;  %v2143_v40 = vld [vmem:[%s3650_s20 + $0x10] sm:$0xff] (!%p2480_p1)  ;;  %v2145_v43 = vld [vmem:[%s3650_s20 + $0x20] sm:$0xff] (!%p2480_p1)  ;;  %v2146_v46 = vld [vmem:[%s3650_s20 + $0x28] sm:$0xff] (!%p2480_p1) }
 0x97b   : > { %2704 = vmatpush1.bf16.msra.mxu1 %v2703_v48  ;;  %v1928_v48 = vld [vmem:[%s3224_s17 + $0x70] sm:$0xff] }
 0x97c   : > { %2706 = vmatprep.subr.bf16.mxu1 %v2705_v53  ;;  %v2739_v50 = vpack.c.bf16 %v1929_v49, %v1928_v48  ;;  %v1823_v53 = vrot.slane %v1818_v52, %v907_v45  ;;  %v2147_v48 = vld [vmem:[%s3650_s20 + $0x30] sm:$0xff] (!%p2480_p1)  ;;  %v2148_v49 = vld [vmem:[%s3650_s20 + $0x38] sm:$0xff] (!%p2480_p1)  ;;  %v2066_v52 = vld [vmem:[%s3651_s6] sm:$0x1] (!%p2480_p1) }
 0x97f   : > { %2708 = vmatpush1.bf16.msra.mxu1 %v2707_v56 }
 0x9ff   : > { %v1776_v25 = vpop.xlane.xlu1 %1775 }
 0xa00   : > { %v1778_v26 = vmul.f32 0.015625, %v1776_v25 }
 0xa02   : > { %v3364_v27 = vsub.f32 %v1771_v22, %v1778_v26  ;;  %v1920_v22 = vld [vmem:[%s3224_s17 + $0x30] sm:$0xff]  ;;  %v1938_v26 = vld [vmem:[%s3224_s17 + $0xc0] sm:$0xff] }
 0xa03   : > { %v2723_v25 = vpack.c.bf16 %v1921_v23, %v1920_v22  ;;  %v2058_v23 = vld [vmem:[%s3648_s26] sm:$0xff] (!%p2480_p1)  ;;  %s3652_s26 = sld [smem:[#allocation31_spill]] (!%p2480_p1) }
 0xa04   : > { %v1780_v28 = vmul.f32 %v3364_v27, %v3364_v27 }
 0xa05   : > { %2724 = vmatpush3.bf16.msra.mxu0 %v2723_v25  ;;  %v2059_v25 = vld [vmem:[%s3649_s16 + $0x8] sm:$0xff] (!%p2480_p1) }
 0xa06   : > { %v1781_v29 = vsel %vm915_vm1, %v1780_v28, 0.0 }
 0xa07   : > { %1782 = vadd.xlane.f32.xlu0 %v1781_v29  ;;  %v1922_v29 = vld [vmem:[%s3224_s17 + $0x40] sm:$0xff] }
 0xa08   : > { %v2727_v42 = vpack.c.bf16 %v1923_v30, %v1922_v29  ;;  %v2061_v29 = vld [vmem:[%s3649_s16 + $0x18] sm:$0xff] (!%p2480_p1)  ;;  %v2985_v30 = vmov (!%p2480_p1), 0.0  }
 0xa94   : > { %v1783_v10 = vpop.xlane.xlu0 %1782 }
 0xa95   : > { %v1784_v11 = vmul.f32 0.015625, %v1783_v10 }
 0xa97   : > { %v1785_v12 = vadd.f32 1e-12, %v1784_v11 }
 0xa99   : > { %2867 = vrsqrt.f32 %v1785_v12 }
 0xaa3   : > { %v2868_v13 = vpop.eup %2867 }
 0xaa4   : > { %v1787_v15 = vmul.f32 %v2868_v13, %v3364_v27  ;;  %v1939_v27 = vld [vmem:[%s3224_s17 + $0xc8] sm:$0xff] }
 0xaa5   : > { %v2725_v28 = vpack.c.bf16 %v1939_v27, %v1938_v26  ;;  %v2060_v26 = vld [vmem:[%s3649_s16 + $0x10] sm:$0xff] (!%p2480_p1)  ;;  %v2983_v27 = vmov (!%p2480_p1), 0.0|0.0  }
 0xaa6   : > { %v1794_v17 = vmul.f32 %v2474_v14, %v1787_v15  ;;  %2753 = vmatprep.subr.bf16.mxu1 (!%p2480_p1), %v2983_v27  ;;  %v2745_v31 = vpack.c.bf16 (!%p2480_p1), %v2061_v29, %v2060_v26 }
 0xaa7   : > { %2726 = vmatprep.subr.bf16.mxu0 %v2725_v28  ;;  %v2742_v28 = vpack.c.bf16 (!%p2480_p1), %v2059_v25, %v2058_v23 }
 0xaa8   : > { %v3408_v18 = vadd.f32 %v2475_v16, %v1794_v17  ;;  %2728 = vmatpush3.bf16.msra.mxu0 %v2727_v42  ;;  %v2141_v42 = vld [vmem:[%s3650_s20] sm:$0xff] (!%p2480_p1) }
 0xaa9   : > { %2730 = vmatprep.subr.bf16.mxu0 %v2729_v33  ;;  %v2062_v33 = vld [vmem:[%s3649_s16 + $0x20] sm:$0xff] (!%p2480_p1)  ;;  %v2754_v35 = vpack.c.bf16 (!%p2480_p1), %v2142_v32, %v2141_v42 }
 0xaaa   : > { %2476 = vmatmul.mubr.msk.f32.vlgmr.msra.gmra.mrb[14].mxu1 %vm915_vm1, %v3408_v18 }
 0xaab   : > { %2662 = vmatprep.mubr.msk.f32.mxu1 (!%p2480_p1), %vm2984_vm8, %v2985_v30  ;;  %2755 = vmatpush3.bf16.msra.mxu1 (!%p2480_p1), %v2754_v35 }
 0xaac   : > { %2732 = vmatpush3.bf16.msra.mxu0 %v2731_v36  ;;  %v2748_v36 = vpack.c.bf16 (!%p2480_p1), %v2063_v34, %v2062_v33  ;;  %2756 = vmatprep.subr.bf16.mxu1 (!%p2480_p1), %v2983_v27 }
 0xaad   : > { %2734 = vmatprep.subr.bf16.mxu0 %v2733_v39  ;;  %v2751_v39 = vpack.c.bf16 (!%p2480_p1), %v2065_v38, %v2064_v37 }
 0xab0   : > { %2736 = vmatpush3.bf16.msra.mxu0 %v2735_v41  ;;  %v2757_v41 = vpack.c.bf16 (!%p2480_p1), %v2144_v0, %v2143_v40 }
 0xab1   : > { %2738 = vmatprep.subr.bf16.mxu0 %v2737_v47  ;;  %v2760_v47 = vpack.c.bf16 (!%p2480_p1), %v2146_v46, %v2145_v43 }
 0xab2   : > { %2758 = vmatpush3.bf16.msra.mxu1 (!%p2480_p1), %v2757_v41 }
 0xab3   : > { %2759 = vmatprep.subr.bf16.mxu1 (!%p2480_p1), %v2983_v27 }
 0xab4   : > { %2740 = vmatpush3.bf16.msra.mxu0 %v2739_v50  ;;  %v2763_v50 = vpack.c.bf16 (!%p2480_p1), %v2148_v49, %v2147_v48 }
 0xab5   : > { %2741 = vmatprep.subr.bf16.mxu0 (!%p2480_p1), %v2983_v27 }
 0xab6   : > { %2761 = vmatpush3.bf16.msra.mxu1 (!%p2480_p1), %v2760_v47 }
 0xab7   : > { %2762 = vmatprep.subr.bf16.mxu1 (!%p2480_p1), %v2983_v27 }
 0xaba   : > { %2764 = vmatpush3.bf16.msra.mxu1 (!%p2480_p1), %v2763_v50 }
 0xb7d   : > { %v1899_v56 = vpop.f32.mrb[14].mxu1 }
 0xb7e   : > { %v1900_v55 = vadd.f32 %v1899_v56, %v1823_v53  ;;  %v1901_v57 = vpop.f32.mrb[15].mxu1 }
 0xb7f   : > { %v1902_v58 = vadd.f32 %v1901_v57, %v1827_v54  ;;  %v2149_v57 = vld [vmem:[%s3652_s26] sm:$0x1] (!%p2480_p1) }
 0xb80   : > { %v1906_v59 = vmul.f32 0.70710677, %v1900_v55  ;;  %v1904_v3 = vmul.f32 0.5, %v1900_v55 }
 0xb81   : > { %v1907_v60 = vmul.f32 0.70710677, %v1902_v58  ;;  %v1905_v1 = vmul.f32 0.5, %v1902_v58 }
 0xb82   : > { %2869 = verf.f32 %v1906_v59 }
 0xb83   : > { %2871 = verf.f32 %v1907_v60 }
 0xb8c   : > { %v2870_v61 = vpop.eup %2869 }
 0xb8d   : > { %v2872_v62 = vpop.eup %2871  ;;  %v1910_v63 = vadd.f32 1.0, %v2870_v61 }
 0xb8e   : > { %v1911_v2 = vadd.f32 1.0, %v2872_v62 }
 0xb8f   : > { %v1912_v45 = vmul.f32 %v1910_v63, %v1904_v3 }
 0xb90   : > { %v1913_v4 = vmul.f32 %v1911_v2, %v1905_v1 }
 0xb92   : > { %2017 = vmatprep.mubr.f32.mxu0 %v1913_v4 }
 0xb93   : > { %2018 = vmatmul.mubr.f32.vlgmr.msra.gmra.mrb[6].mxu0 %v1912_v45 }
 0xb94   : > { %2643 = vmatprep.mubr.msk.f32.mxu0 (!%p2480_p1), %vm2984_vm8, %v2985_v30  ;;  %2743 = vmatpush3.bf16.msra.mxu0 (!%p2480_p1), %v2742_v28 }
 0xb95   : > { %2744 = vmatprep.subr.bf16.mxu0 (!%p2480_p1), %v2983_v27 }
 0xb98   : > { %2746 = vmatpush3.bf16.msra.mxu0 (!%p2480_p1), %v2745_v31 }
 0xb99   : > { %2747 = vmatprep.subr.bf16.mxu0 (!%p2480_p1), %v2983_v27 }
 0xb9c   : > { %2749 = vmatpush3.bf16.msra.mxu0 (!%p2480_p1), %v2748_v36 }
 0xb9d   : > { %2750 = vmatprep.subr.bf16.mxu0 (!%p2480_p1), %v2983_v27 }
 0xba0   : > { %2752 = vmatpush3.bf16.msra.mxu0 (!%p2480_p1), %v2751_v39 }
 0xc66   : > { %v2547_v44 = vpop.f32.mrb[6].mxu0 }
 0xc67   : > { %v2548_v5 = vpop.f32.mrb[7].mxu0 }
 0xc68   : > { %v2549_v6 = vadd.f32 %v2548_v5, %v2547_v44 }
 0xc6a   : > { %v2020_v7 = vadd.f32 %v2549_v6, %v2477_v51 }
 0xc6c   : > { %v2023_v24 = vadd.f32 %v2020_v7, %v3408_v18  ;;  %v2478_v18 = vld [vmem:[%s844_s5] ss:$0 sm:$0xff] }
 0xc6e   : > { %v2026_v8 = vsel %vm915_vm1, %v2023_v24, 0.0 }
 0xc6f   : > { %2027 = vadd.xlane.f32.xlu0 %v2026_v8 }
 0xcfc   : > { %v2028_v9 = vpop.xlane.xlu0 %2027 }
 0xcfd   : > { %v2029_v10 = vmul.f32 0.015625, %v2028_v9 }
 0xcff   : > { %v2030_v11 = vsub.f32 %v2023_v24, %v2029_v10 }
 0xd01   : > { %v2031_v12 = vmul.f32 %v2030_v11, %v2030_v11 }
 0xd03   : > { %v2032_v13 = vsel %vm915_vm1, %v2031_v12, 0.0 }
 0xd04   : > { %2033 = vadd.xlane.f32.xlu1 %v2032_v13 }
 0xd91   : > { %v2034_v14 = vpop.xlane.xlu1 %2033 }
 0xd92   : > { %v2035_v15 = vmul.f32 0.015625, %v2034_v14 }
 0xd94   : > { %v2036_v16 = vadd.f32 1e-12, %v2035_v15 }
 0xd96   : > { %2873 = vrsqrt.f32 %v2036_v16 }
 0xda0   : > { %v2874_v17 = vpop.eup %2873 }
 0xda1   : > { %v2038_v19 = vmul.f32 %v2874_v17, %v2030_v11  ;;  %2057 = sbr.rel (%p2480_p1) target bundleno = 3935 (0xf5f), region = 108 }
 0xda3   : > { %v2045_v21 = vmul.f32 %v2478_v18, %v2038_v19 }
 0xda5   : > { %v2052_v22 = vadd.f32 %v2479_v20, %v2045_v21 }
 0xda7   : > { %2053 = vst.msk [vmem:[#allocation2] sm:$0xff] %vm915_vm1, %v2052_v22  ;;  %2644 = vmatmul.mubr.msk.f32.vlgmr.msra.gmra.mrb[0].mxu0 (!%p2480_p1), %vm915_vm1, %v2052_v22 }
 0xe7a   : > { %v2136_v53 = vpop.f32.mrb[0].mxu0 }
 0xe7b   : > { %v2137_v54 = vadd.f32 %v2136_v53, %v2066_v52  ;;  %v2645_v56 = vpop.f32.mrb[1].mxu0 }
 0xe7d   : > { %2875 = vtanh.f32 %v2137_v54 }
 0xe87   : > { %v2876_v55 = vpop.eup %2875 }
 0xe88   : > { %2663 = vmatmul.mubr.msk.f32.vlgmr.msra.gmra.mrb[0].mxu1 %vm915_vm1, %v2876_v55 }
 0xf5b   : > { %v2219_v58 = vpop.f32.mrb[0].mxu1 }
 0xf5c   : > { %v2220_v59 = vadd.f32 %v2219_v58, %v2149_v57  ;;  %v2664_v60 = vpop.f32.mrb[1].mxu1 }
 0xf5e   : > { %2224 = vst.msk [vmem:[%s3236_s3] sm:$0x1] %vm2223_vm9, %v2220_v59 }
 0xf5f PF: > { %s3653_s25 = sld [smem:[#allocation10_spill]]  ;;  %s3655_s23 = sld [smem:[#allocation32_spill]] }
 0xf60   : > { %s2238_s0 = sshll.u32 %s3236_s3, 4  ;;  %s3657_s17 = sand.u32 1, %s2947_s22   ;;  %s2239_s0 = int_to_ptr.vmem [resolvable:$true] %s2238_s0 }
 0xf61   : > { %s2226_s2 = scalar_lea.sflag [#allocation5], %s3657_s17  ;;  %s2877_s29 = scalar_lea.vmem %s2239_s0, 16 }
 0xf62   : > { %p2878_p2 = scmp.ne.s32.totalorder %s2239_s0, %s2877_s29  ;;  %s2986_s18 = smov [#allocation4]  }
 0xf63   : > { %s2881_s27 = sshll.u32 %s2986_s18, 4  ;;  %s2882_s27 = int_to_ptr.vmem [resolvable:$false] %s2881_s27 }
 0xf64   : > { %p2879_p4 = pnand %p2878_p2, %p3141_p3  ;;  %s2883_s6 = scalar_lea.vmem %s2882_s27, 32 }
 0xf65   : > { %s2483_s5 = sshll.u32 %s3653_s25, 4  ;;  %s3656_s30 = smov %s3655_s23 }
 0xf66   : > { %s3518_s24 = scalar_lea.hbm %s3655_s23, %s2483_s5  ;;  %p2880_p5 = pneg %p2879_p4 }
 0xf67   : > { %p2884_p6 = scmp.lt.s32.totalorder %s2239_s0, %s2882_s27  ;;  %p2885_p7 = scmp.lt.s32.totalorder %s2883_s6, %s2877_s29 }
 0xf69   : > { %p2886_p8 = por %p2885_p7, %p2884_p6 }
 0xf6b   : > { %p2887_p10 = pnand %p2886_p8, %p2880_p5 }
 0xf6d   : > { %2890 = shalt.err (!%p2887_p10)
}
 0xf6e   : > { %s2891_s3 = scalar_lea.hbm %s3518_s24, 16  ;;  %s2895_s26 = scalar_lea.hbm %s3656_s30, 32 }
 0xf6f   : > { %p2892_p11 = scmp.ne.s32.totalorder %s3518_s24, %s2891_s3  ;;  %p2896_p0 = scmp.lt.u32.totalorder %s3518_s24, %s3656_s30 }
 0xf70   : > { %p2897_p1 = scmp.lt.u32.totalorder %s2895_s26, %s2891_s3  ;;  %p2899_p4 = scmp.lt.u32.totalorder %s2891_s3, %s3518_s24 }
 0xf71   : > { %p2893_p12 = pnand %p2892_p11, %p3141_p3 }
 0xf72   : > { %p2898_p2 = por %p2897_p1, %p2896_p0 }
 0xf73   : > { %p2894_p13 = pneg %p2893_p12 }
 0xf74   : > { %p2900_p5 = por %p2899_p4, %p2898_p2 }
 0xf76   : > { %p2901_p6 = pnand %p2900_p5, %p2894_p13 }
 0xf78   : > { %2904 = shalt.err (!%p2901_p6)
}
 0xf79   : > { %2765 = dma.vmem_to_hbm [thread:$0]  (%p3141_p3), %s2239_s0, 16, %s3518_s24, %s2226_s2  }
 0xf7a PF: > { %s3658_s21 = sld [smem:[#allocation13_spill]]  ;;  %s3659_s1 = sld [smem:[#allocation7_spill]] }
 0xf80   : > { %p2771_p7 = scmp.ge.s32.totalorder %s3658_s21, 2  ;;  %s2250_s17 = sand.u32 1, %s3659_s1  }
 0xf81   : > { %s2251_s29 = scalar_lea.sflag [#allocation5], %s2250_s17 }
 0xf82   : > { %p2768_p8 = pnand %p2771_p7, %p3151_p9 }
 0xf84   : > { %2938 = dma.done.wait (!%p2768_p8), %s2251_s29, 16  }
 0xf85   : > { %2940 = vsyncadd (!%p2768_p8), %s2251_s29, 4294967280  ;;  %s33_s26 = sadd.s32 1, %s3658_s21   ;;  %s3661_s18 = sld [smem:[#allocation8_spill]] }
 0xf86   : > { %p30_p10 = scmp.ge.s32.totalorder %s33_s26, 6   ;;  %s3662_s23 = sld [smem:[#allocation18_spill]] }
 0xf87   : > { %s3663_s24 = sld [smem:[#allocation11_spill]]  ;;  %s3664_s2 = sld [smem:[#allocation12_spill]] }
 0xf88   : > { %s3665_s25 = sld [smem:[#allocation14_spill]]  ;;  %s3666_s3 = sld [smem:[#allocation16_spill]] }
 0xf89   : > { %s3667_s1 = smov %s2947_s22  ;;  %32 = sbr.rel (!%p30_p10) target bundleno = 18 (0x12), region = 182 }
 0xf8b   : > { %s3668_s22 = smov %s3661_s18 }
 0xf90   :  { %2255 = vsyncpa [#allocation5], 1 }
 0xf91   :  { %2257 = vsyncpa [#allocation5 + $0x1], 1 }

</bundles_post_ra>
